<compile_context>
chip_gen: v5e
topology: v5e:2x2
jax: 0.10.0
libtpu: 0.0.40
codegen_flags: <defaults>
</compile_context>

<pallas_src>
import functools
import math

import jax
import jax.numpy as jnp
from jax.experimental import pallas as pl
from jax.experimental.pallas import tpu as pltpu


# ---------------------------------------------------------------------------
# Small deterministic BERT-for-sequence-classification configuration
# ---------------------------------------------------------------------------
VOCAB = 100
MAX_POS = 16
TYPE_VOCAB = 2
HIDDEN = 32
N_HEADS = 4
HEAD_DIM = HIDDEN // N_HEADS
INTERMEDIATE = 64
N_LAYERS = 2
NUM_CLASS = 3
LN_EPS = 1e-12


# ---------------------------------------------------------------------------
# Fused encoder kernel: embedding LayerNorm + N_LAYERS x (MHA + FFN) per batch element
# ---------------------------------------------------------------------------
def _bert_encoder_kernel(x_ref, mask_ref, eg_ref, eb_ref,
                         wqkv_ref, bqkv_ref, woh_ref, bo_ref, g1_ref, b1_ref,
                         w1_ref, bi1_ref, w2_ref, bi2_ref, g2_ref, b2_ref,
                         o_ref, *, n_layers, n_heads, head_dim, eps, scale):
    """Grid axis 0 = batch.  x_ref: (1, S, H) embeddings, mask_ref: (1, 1, S) additive
    key mask, weights are full (L, ...) stacks resident in VMEM.  Output: (1, S, H)."""
    S = x_ref.shape[1]

    def layer_norm(y, g, b):                      # f32 statistics
        mean = jnp.mean(y, axis=-1, keepdims=True)
        var = jnp.mean(jnp.square(y - mean), axis=-1, keepdims=True)
        return (y - mean) * jax.lax.rsqrt(var + eps) * g + b

    mask = mask_ref[...]                          # (1, 1, S), broadcasts over (heads, q, k)
    x = layer_norm(x_ref[0], eg_ref[...], eb_ref[...])          # embedding LayerNorm, (S, H) f32

    for l in range(n_layers):                     # static unroll; all weights already in VMEM
        # ---- multi-head self-attention -------------------------------------------------
        xb = x.astype(jnp.bfloat16)
        qkv = jnp.dot(xb, wqkv_ref[l], preferred_element_type=jnp.float32) + bqkv_ref[l]  # (S, 3H)
        # one reshape + one transpose (outside any loop) -> heads-leading layout
        qkv = jnp.swapaxes(qkv.reshape(S, 3 * n_heads, head_dim), 0, 1)   # (3*nh, S, hd)
        q = qkv[0:n_heads].astype(jnp.bfloat16)                           # (nh, S, hd)
        k = qkv[n_heads:2 * n_heads].astype(jnp.bfloat16)
        v = qkv[2 * n_heads:3 * n_heads].astype(jnp.bfloat16)

        s = jnp.einsum('hqd,hkd->hqk', q, k,
                       preferred_element_type=jnp.float32) * scale        # (nh, S, S) f32
        s = s + mask
        s = s - jnp.max(s, axis=-1, keepdims=True)
        p = jnp.exp(s)
        p = p / jnp.sum(p, axis=-1, keepdims=True)                        # exact softmax

        ctx = jnp.einsum('hqk,hkd->hqd', p.astype(jnp.bfloat16), v,
                         preferred_element_type=jnp.float32)              # (nh, S, hd)
        # output projection folded over heads: wo stored as (nh, hd, H); sum over heads
        y = jnp.einsum('hsd,hdn->hsn', ctx.astype(jnp.bfloat16), woh_ref[l],
                       preferred_element_type=jnp.float32)                # (nh, S, H)
        y = jnp.sum(y, axis=0) + bo_ref[l] + x                            # + residual
        x = layer_norm(y, g1_ref[l], b1_ref[l])

        # ---- feed-forward ---------------------------------------------------------------
        xb = x.astype(jnp.bfloat16)
        h = jnp.dot(xb, w1_ref[l], preferred_element_type=jnp.float32) + bi1_ref[l]
        h = 0.5 * h * (1.0 + jax.lax.erf(h * (1.0 / math.sqrt(2.0))))     # exact (erf) GELU
        y = jnp.dot(h.astype(jnp.bfloat16), w2_ref[l],
                    preferred_element_type=jnp.float32) + bi2_ref[l] + x
        x = layer_norm(y, g2_ref[l], b2_ref[l])

    o_ref[0] = x.astype(o_ref.dtype)              # single lane-masked store per batch element


def bert_encoder(emb, ext_mask, params):
    """emb: (B, S, H) f32 raw embedding sum, ext_mask: (B, 1, S) additive mask."""
    B, S, H = emb.shape
    L = N_LAYERS

    def full(shape):
        return pl.BlockSpec(shape, lambda b, _s=shape: (0,) * len(_s))

    kernel = functools.partial(
        _bert_encoder_kernel, n_layers=L, n_heads=N_HEADS, head_dim=HEAD_DIM,
        eps=LN_EPS, scale=1.0 / math.sqrt(HEAD_DIM))

    return pl.pallas_call(
        kernel,
        out_shape=jax.ShapeDtypeStruct((B, S, H), jnp.float32),
        grid=(B,),
        in_specs=[
            pl.BlockSpec((1, S, H), lambda b: (b, 0, 0)),      # embeddings (per batch)
            pl.BlockSpec((1, 1, S), lambda b: (b, 0, 0)),      # additive attention mask
            full((1, H)), full((1, H)),                        # embedding LN gamma / beta
            full((L, H, 3 * H)), full((L, 1, 3 * H)),          # fused QKV weight / bias
            full((L, N_HEADS, HEAD_DIM, H)), full((L, 1, H)),  # out-proj weight (head-blocked) / bias
            full((L, 1, H)), full((L, 1, H)),                  # attention LN gamma / beta
            full((L, H, INTERMEDIATE)), full((L, 1, INTERMEDIATE)),   # FFN1
            full((L, INTERMEDIATE, H)), full((L, 1, H)),               # FFN2
            full((L, 1, H)), full((L, 1, H)),                  # output LN gamma / beta
        ],
        out_specs=pl.BlockSpec((1, S, H), lambda b: (b, 0, 0)),
        compiler_params=pltpu.CompilerParams(dimension_semantics=("parallel",)),
    )(emb, ext_mask,
      params["emb_ln_g"], params["emb_ln_b"],
      params["w_qkv"], params["b_qkv"], params["wo_h"], params["bo"],
      params["ln1_g"], params["ln1_b"], params["w1"], params["b1"],
      params["w2"], params["b2"], params["ln2_g"], params["ln2_b"])


# ---------------------------------------------------------------------------
# Deterministic parameter initialisation (stands in for from_pretrained)
# ---------------------------------------------------------------------------
def init_params(key):
    def dense(k, fan_in, fan_out):
        return 0.02 * jax.random.normal(k, (fan_in, fan_out), jnp.float32)

    keys = iter(jax.random.split(key, 64))

    w_qkv, wo_h, w1, w2 = [], [], [], []
    for _ in range(N_LAYERS):
        wq = dense(next(keys), HIDDEN, HIDDEN)
        wk = dense(next(keys), HIDDEN, HIDDEN)
        wv = dense(next(keys), HIDDEN, HIDDEN)
        w_qkv.append(jnp.concatenate([wq, wk, wv], axis=1))              # (H, 3H)
        wo_h.append(dense(next(keys), HIDDEN, HIDDEN)
                    .reshape(N_HEADS, HEAD_DIM, HIDDEN))                 # head-blocked out proj
        w1.append(dense(next(keys), HIDDEN, INTERMEDIATE))
        w2.append(dense(next(keys), INTERMEDIATE, HIDDEN))

    L = N_LAYERS
    params = {
        "word_emb": 0.02 * jax.random.normal(next(keys), (VOCAB, HIDDEN), jnp.float32),
        "pos_emb": 0.02 * jax.random.normal(next(keys), (MAX_POS, HIDDEN), jnp.float32),
        "type_emb": 0.02 * jax.random.normal(next(keys), (TYPE_VOCAB, HIDDEN), jnp.float32),
        "emb_ln_g": jnp.ones((1, HIDDEN), jnp.float32),
        "emb_ln_b": jnp.zeros((1, HIDDEN), jnp.float32),
        # stacked, layer-major encoder weights; MXU operands stored bf16, the rest f32
        "w_qkv": jnp.stack(w_qkv).astype(jnp.bfloat16),                  # (L, H, 3H)
        "b_qkv": jnp.zeros((L, 1, 3 * HIDDEN), jnp.float32),
        "wo_h": jnp.stack(wo_h).astype(jnp.bfloat16),                    # (L, nh, hd, H)
        "bo": jnp.zeros((L, 1, HIDDEN), jnp.float32),
        "ln1_g": jnp.ones((L, 1, HIDDEN), jnp.float32),
        "ln1_b": jnp.zeros((L, 1, HIDDEN), jnp.float32),
        "w1": jnp.stack(w1).astype(jnp.bfloat16),                        # (L, H, I)
        "b1": jnp.zeros((L, 1, INTERMEDIATE), jnp.float32),
        "w2": jnp.stack(w2).astype(jnp.bfloat16),                        # (L, I, H)
        "b2": jnp.zeros((L, 1, HIDDEN), jnp.float32),
        "ln2_g": jnp.ones((L, 1, HIDDEN), jnp.float32),
        "ln2_b": jnp.zeros((L, 1, HIDDEN), jnp.float32),
        # pooler / classifier stay f32, plain JAX
        "pooler_w": dense(next(keys), HIDDEN, HIDDEN),
        "pooler_b": jnp.zeros((HIDDEN,), jnp.float32),
        "cls_w": dense(next(keys), HIDDEN, NUM_CLASS),
        "cls_b": jnp.zeros((NUM_CLASS,), jnp.float32),
    }
    return params


# ---------------------------------------------------------------------------
# Forward pass (mirrors BertForSequenceClassification + BertClassifier.forward)
# ---------------------------------------------------------------------------
def bert_classifier_forward(params, input_ids, attention_mask, labels):
    """Equivalent of BertClassifier.forward: returns (logits, labels)."""
    B, S = input_ids.shape

    # Embeddings (word + position + token_type[0]); dropout = identity (eval).
    # TODO(synk): token_type_ids are hard-coded to 0 (matches calling BERT without them).
    emb = (jnp.take(params["word_emb"], input_ids, axis=0)
           + params["pos_emb"][:S][None, :, :]
           + params["type_emb"][0][None, None, :])                       # (B, S, H) f32

    # Extended attention mask: (1 - mask) * -10000 on padded key positions.
    ext_mask = ((1.0 - attention_mask.astype(jnp.float32)) * -10000.0).reshape(B, 1, S)

    # Single fused Pallas kernel: embedding LayerNorm + all encoder layers.
    x = bert_encoder(emb, ext_mask, params)                              # (B, S, H)

    # Pooler + classifier: tiny (B,H)@(H,{H,3}) matmuls -> plain JAX (launch > compute).
    cls_tok = x[:, 0, :]
    pooled = jnp.tanh(cls_tok @ params["pooler_w"] + params["pooler_b"])
    logits = pooled @ params["cls_w"] + params["cls_b"]                  # (B, NUM_CLASS)
    return logits, labels


# ---------------------------------------------------------------------------
if __name__ == "__main__":
    key = jax.random.PRNGKey(0)
    kp, ki, km, kl = jax.random.split(key, 4)

    params = init_params(kp)

    B, S = 2, 8
    input_ids = jax.random.randint(ki, (B, S), 0, VOCAB, dtype=jnp.int32)
    attention_mask = jnp.concatenate(
        [jnp.ones((B, S - 2), jnp.int32), jnp.zeros((B, 2), jnp.int32)], axis=1)
    labels = jax.random.randint(kl, (B,), 0, NUM_CLASS, dtype=jnp.int32)

    forward = jax.jit(bert_classifier_forward)
    logits, out_labels = forward(params, input_ids, attention_mask, labels)
    jax.block_until_ready(logits)
    jax.block_until_ready(out_labels)

    assert logits.shape == (B, NUM_CLASS)
    assert out_labels.shape == (B,)
    assert bool(jnp.all(jnp.isfinite(logits)))
    print("KERNEL_OK")
</pallas_src>

<mosaic_0001>
module attributes {stable_mosaic.version = 11 : i64} {
  func.func @_bert_encoder_kernel(%arg0: i32, %arg1: memref<1x8x32xf32, #tpu.memory_space<vmem>>, %arg2: memref<1x1x8xf32, #tpu.memory_space<vmem>>, %arg3: memref<1x32xf32, #tpu.memory_space<vmem>>, %arg4: memref<1x32xf32, #tpu.memory_space<vmem>>, %arg5: memref<2x32x96xbf16, #tpu.memory_space<vmem>>, %arg6: memref<2x1x96xf32, #tpu.memory_space<vmem>>, %arg7: memref<2x4x8x32xbf16, #tpu.memory_space<vmem>>, %arg8: memref<2x1x32xf32, #tpu.memory_space<vmem>>, %arg9: memref<2x1x32xf32, #tpu.memory_space<vmem>>, %arg10: memref<2x1x32xf32, #tpu.memory_space<vmem>>, %arg11: memref<2x32x64xbf16, #tpu.memory_space<vmem>>, %arg12: memref<2x1x64xf32, #tpu.memory_space<vmem>>, %arg13: memref<2x64x32xbf16, #tpu.memory_space<vmem>>, %arg14: memref<2x1x32xf32, #tpu.memory_space<vmem>>, %arg15: memref<2x1x32xf32, #tpu.memory_space<vmem>>, %arg16: memref<2x1x32xf32, #tpu.memory_space<vmem>>, %arg17: memref<1x8x32xf32, #tpu.memory_space<vmem>>) attributes {dimension_semantics = [#tpu.dimension_semantics<parallel>], iteration_bounds = array<i64: 2>, scalar_prefetch = 0 : i64, scratch_operands = 0 : i64, tpu.core_type = #tpu.core_type<tc>, window_params = [{transform_indices = @transform_0, window_bounds = array<i64: 1, 8, 32>}, {transform_indices = @transform_1, window_bounds = array<i64: 1, 1, 8>}, {pipeline_mode = #tpu.pipeline_mode<synchronous>, transform_indices = @transform_2, window_bounds = array<i64: 1, 32>}, {pipeline_mode = #tpu.pipeline_mode<synchronous>, transform_indices = @transform_3, window_bounds = array<i64: 1, 32>}, {pipeline_mode = #tpu.pipeline_mode<synchronous>, transform_indices = @transform_4, window_bounds = array<i64: 2, 32, 96>}, {pipeline_mode = #tpu.pipeline_mode<synchronous>, transform_indices = @transform_5, window_bounds = array<i64: 2, 1, 96>}, {pipeline_mode = #tpu.pipeline_mode<synchronous>, transform_indices = @transform_6, window_bounds = array<i64: 2, 4, 8, 32>}, {pipeline_mode = #tpu.pipeline_mode<synchronous>, transform_indices = @transform_7, window_bounds = array<i64: 2, 1, 32>}, {pipeline_mode = #tpu.pipeline_mode<synchronous>, transform_indices = @transform_8, window_bounds = array<i64: 2, 1, 32>}, {pipeline_mode = #tpu.pipeline_mode<synchronous>, transform_indices = @transform_9, window_bounds = array<i64: 2, 1, 32>}, {pipeline_mode = #tpu.pipeline_mode<synchronous>, transform_indices = @transform_10, window_bounds = array<i64: 2, 32, 64>}, {pipeline_mode = #tpu.pipeline_mode<synchronous>, transform_indices = @transform_11, window_bounds = array<i64: 2, 1, 64>}, {pipeline_mode = #tpu.pipeline_mode<synchronous>, transform_indices = @transform_12, window_bounds = array<i64: 2, 64, 32>}, {pipeline_mode = #tpu.pipeline_mode<synchronous>, transform_indices = @transform_13, window_bounds = array<i64: 2, 1, 32>}, {pipeline_mode = #tpu.pipeline_mode<synchronous>, transform_indices = @transform_14, window_bounds = array<i64: 2, 1, 32>}, {pipeline_mode = #tpu.pipeline_mode<synchronous>, transform_indices = @transform_15, window_bounds = array<i64: 2, 1, 32>}, {transform_indices = @transform_16, window_bounds = array<i64: 1, 8, 32>}]} {
    %c0 = arith.constant 0 : index
    %c0_0 = arith.constant 0 : index
    %c0_1 = arith.constant 0 : index
    %0 = vector.load %arg2[%c0, %c0_0, %c0_1] : memref<1x1x8xf32, #tpu.memory_space<vmem>>, vector<1x1x8xf32>
    %c0_2 = arith.constant 0 : index
    %c0_3 = arith.constant 0 : index
    %c0_4 = arith.constant 0 : index
    %1 = vector.load %arg1[%c0_2, %c0_3, %c0_4] : memref<1x8x32xf32, #tpu.memory_space<vmem>>, vector<1x8x32xf32>
    %2 = vector.shape_cast %1 : vector<1x8x32xf32> to vector<8x32xf32>
    %c0_5 = arith.constant 0 : index
    %c0_6 = arith.constant 0 : index
    %3 = vector.load %arg3[%c0_5, %c0_6] : memref<1x32xf32, #tpu.memory_space<vmem>>, vector<1x32xf32>
    %c0_7 = arith.constant 0 : index
    %c0_8 = arith.constant 0 : index
    %4 = vector.load %arg4[%c0_7, %c0_8] : memref<1x32xf32, #tpu.memory_space<vmem>>, vector<1x32xf32>
    %cst = arith.constant dense<0.000000e+00> : vector<8xf32>
    %5 = vector.multi_reduction <add>, %2, %cst [1] : vector<8x32xf32> to vector<8xf32>
    %6 = vector.shape_cast %5 : vector<8xf32> to vector<8x1xf32>
    %cst_9 = arith.constant 3.200000e+01 : f32
    %7 = vector.broadcast %cst_9 : f32 to vector<8x1xf32>
    %8 = arith.divf %6, %7 : vector<8x1xf32>
    %9 = vector.broadcast %8 : vector<8x1xf32> to vector<8x32xf32>
    %10 = arith.subf %2, %9 : vector<8x32xf32>
    %11 = arith.mulf %10, %10 : vector<8x32xf32>
    %cst_10 = arith.constant dense<0.000000e+00> : vector<8xf32>
    %12 = vector.multi_reduction <add>, %11, %cst_10 [1] : vector<8x32xf32> to vector<8xf32>
    %13 = vector.shape_cast %12 : vector<8xf32> to vector<8x1xf32>
    %cst_11 = arith.constant 3.200000e+01 : f32
    %14 = vector.broadcast %cst_11 : f32 to vector<8x1xf32>
    %15 = arith.divf %13, %14 : vector<8x1xf32>
    %16 = vector.broadcast %8 : vector<8x1xf32> to vector<8x32xf32>
    %17 = arith.subf %2, %16 : vector<8x32xf32>
    %cst_12 = arith.constant 9.99999996E-13 : f32
    %18 = vector.broadcast %cst_12 : f32 to vector<8x1xf32>
    %19 = arith.addf %15, %18 : vector<8x1xf32>
    %20 = math.rsqrt %19 : vector<8x1xf32>
    %21 = vector.broadcast %20 : vector<8x1xf32> to vector<8x32xf32>
    %22 = arith.mulf %17, %21 : vector<8x32xf32>
    %23 = vector.broadcast %3 : vector<1x32xf32> to vector<8x32xf32>
    %24 = arith.mulf %22, %23 : vector<8x32xf32>
    %25 = vector.broadcast %4 : vector<1x32xf32> to vector<8x32xf32>
    %26 = arith.addf %24, %25 : vector<8x32xf32>
    %27 = arith.truncf %26 : vector<8x32xf32> to vector<8x32xbf16>
    %c0_13 = arith.constant 0 : index
    %c0_14 = arith.constant 0 : index
    %c0_15 = arith.constant 0 : index
    %28 = vector.load %arg5[%c0_13, %c0_14, %c0_15] : memref<2x32x96xbf16, #tpu.memory_space<vmem>>, vector<1x32x96xbf16>
    %29 = vector.shape_cast %28 : vector<1x32x96xbf16> to vector<32x96xbf16>
    %cst_16 = arith.constant dense<0.000000e+00> : vector<8x96xf32>
    %30 = tpu.matmul %27, %29, %cst_16 {dimension_numbers = #tpu.dot_dimension_numbers<[1], [0], [0], [1], [0, 0, 1, 1], [], []>} : vector<8x32xbf16>, vector<32x96xbf16>, vector<8x96xf32> -> vector<8x96xf32>
    %c0_17 = arith.constant 0 : index
    %c0_18 = arith.constant 0 : index
    %c0_19 = arith.constant 0 : index
    %31 = vector.load %arg6[%c0_17, %c0_18, %c0_19] : memref<2x1x96xf32, #tpu.memory_space<vmem>>, vector<1x1x96xf32>
    %32 = vector.shape_cast %31 : vector<1x1x96xf32> to vector<1x96xf32>
    %33 = vector.broadcast %32 : vector<1x96xf32> to vector<8x96xf32>
    %34 = arith.addf %30, %33 : vector<8x96xf32>
    %35 = vector.shape_cast %34 : vector<8x96xf32> to vector<8x12x8xf32>
    %36 = tpu.transpose %35, [1, 0, 2] : vector<8x12x8xf32> -> vector<12x8x8xf32>
    %37 = vector.extract_strided_slice %36 {offsets = [0, 0, 0], sizes = [4, 8, 8], strides = [1, 1, 1]} : vector<12x8x8xf32> to vector<4x8x8xf32>
    %38 = arith.truncf %37 : vector<4x8x8xf32> to vector<4x8x8xbf16>
    %39 = vector.extract_strided_slice %36 {offsets = [4, 0, 0], sizes = [4, 8, 8], strides = [1, 1, 1]} : vector<12x8x8xf32> to vector<4x8x8xf32>
    %40 = arith.truncf %39 : vector<4x8x8xf32> to vector<4x8x8xbf16>
    %41 = vector.extract_strided_slice %36 {offsets = [8, 0, 0], sizes = [4, 8, 8], strides = [1, 1, 1]} : vector<12x8x8xf32> to vector<4x8x8xf32>
    %42 = arith.truncf %41 : vector<4x8x8xf32> to vector<4x8x8xbf16>
    "tpu.trace_start"() <{level = 10 : i32, message = "hqd,hkd->hqk"}> : () -> ()
    %cst_20 = arith.constant dense<0.000000e+00> : vector<4x8x8xf32>
    %43 = tpu.matmul %38, %40, %cst_20 {dimension_numbers = #tpu.dot_dimension_numbers<[2], [2], [1], [1], [0, 0, 0, 1, 1, 1], [0], [0]>} : vector<4x8x8xbf16>, vector<4x8x8xbf16>, vector<4x8x8xf32> -> vector<4x8x8xf32>
    "tpu.trace_stop"() : () -> ()
    %cst_21 = arith.constant 0.353553385 : f32
    %44 = vector.broadcast %cst_21 : f32 to vector<4x8x8xf32>
    %45 = arith.mulf %43, %44 : vector<4x8x8xf32>
    %46 = vector.broadcast %0 : vector<1x1x8xf32> to vector<4x8x8xf32>
    %47 = arith.addf %45, %46 : vector<4x8x8xf32>
    %cst_22 = arith.constant dense<0xFF800000> : vector<4x8xf32>
    %48 = vector.multi_reduction <maximumf>, %47, %cst_22 [2] : vector<4x8x8xf32> to vector<4x8xf32>
    %49 = vector.shape_cast %48 : vector<4x8xf32> to vector<4x8x1xf32>
    %50 = vector.broadcast %49 : vector<4x8x1xf32> to vector<4x8x8xf32>
    %51 = arith.subf %47, %50 : vector<4x8x8xf32>
    %52 = math.exp %51 : vector<4x8x8xf32>
    %cst_23 = arith.constant dense<0.000000e+00> : vector<4x8xf32>
    %53 = vector.multi_reduction <add>, %52, %cst_23 [2] : vector<4x8x8xf32> to vector<4x8xf32>
    %54 = vector.shape_cast %53 : vector<4x8xf32> to vector<4x8x1xf32>
    %55 = vector.broadcast %54 : vector<4x8x1xf32> to vector<4x8x8xf32>
    %56 = arith.divf %52, %55 : vector<4x8x8xf32>
    %57 = arith.truncf %56 : vector<4x8x8xf32> to vector<4x8x8xbf16>
    "tpu.trace_start"() <{level = 10 : i32, message = "hqk,hkd->hqd"}> : () -> ()
    %cst_24 = arith.constant dense<0.000000e+00> : vector<4x8x8xf32>
    %58 = tpu.matmul %57, %42, %cst_24 {dimension_numbers = #tpu.dot_dimension_numbers<[2], [1], [1], [2], [0, 0, 0, 1, 1, 2], [0], [0]>} : vector<4x8x8xbf16>, vector<4x8x8xbf16>, vector<4x8x8xf32> -> vector<4x8x8xf32>
    "tpu.trace_stop"() : () -> ()
    %59 = arith.truncf %58 : vector<4x8x8xf32> to vector<4x8x8xbf16>
    %c0_25 = arith.constant 0 : index
    %c0_26 = arith.constant 0 : index
    %c0_27 = arith.constant 0 : index
    %c0_28 = arith.constant 0 : index
    %60 = vector.load %arg7[%c0_25, %c0_26, %c0_27, %c0_28] : memref<2x4x8x32xbf16, #tpu.memory_space<vmem>>, vector<1x4x8x32xbf16>
    %61 = vector.shape_cast %60 : vector<1x4x8x32xbf16> to vector<4x8x32xbf16>
    "tpu.trace_start"() <{level = 10 : i32, message = "hsd,hdn->hsn"}> : () -> ()
    %cst_29 = arith.constant dense<0.000000e+00> : vector<4x8x32xf32>
    %62 = tpu.matmul %59, %61, %cst_29 {dimension_numbers = #tpu.dot_dimension_numbers<[2], [1], [1], [2], [0, 0, 0, 1, 1, 2], [0], [0]>} : vector<4x8x8xbf16>, vector<4x8x32xbf16>, vector<4x8x32xf32> -> vector<4x8x32xf32>
    "tpu.trace_stop"() : () -> ()
    %cst_30 = arith.constant dense<0.000000e+00> : vector<8x32xf32>
    %63 = vector.multi_reduction <add>, %62, %cst_30 [0] : vector<4x8x32xf32> to vector<8x32xf32>
    %c0_31 = arith.constant 0 : index
    %c0_32 = arith.constant 0 : index
    %c0_33 = arith.constant 0 : index
    %64 = vector.load %arg8[%c0_31, %c0_32, %c0_33] : memref<2x1x32xf32, #tpu.memory_space<vmem>>, vector<1x1x32xf32>
    %65 = vector.shape_cast %64 : vector<1x1x32xf32> to vector<1x32xf32>
    %66 = vector.broadcast %65 : vector<1x32xf32> to vector<8x32xf32>
    %67 = arith.addf %63, %66 : vector<8x32xf32>
    %68 = arith.addf %67, %26 : vector<8x32xf32>
    %c0_34 = arith.constant 0 : index
    %c0_35 = arith.constant 0 : index
    %c0_36 = arith.constant 0 : index
    %69 = vector.load %arg9[%c0_34, %c0_35, %c0_36] : memref<2x1x32xf32, #tpu.memory_space<vmem>>, vector<1x1x32xf32>
    %70 = vector.shape_cast %69 : vector<1x1x32xf32> to vector<1x32xf32>
    %c0_37 = arith.constant 0 : index
    %c0_38 = arith.constant 0 : index
    %c0_39 = arith.constant 0 : index
    %71 = vector.load %arg10[%c0_37, %c0_38, %c0_39] : memref<2x1x32xf32, #tpu.memory_space<vmem>>, vector<1x1x32xf32>
    %72 = vector.shape_cast %71 : vector<1x1x32xf32> to vector<1x32xf32>
    %cst_40 = arith.constant dense<0.000000e+00> : vector<8xf32>
    %73 = vector.multi_reduction <add>, %68, %cst_40 [1] : vector<8x32xf32> to vector<8xf32>
    %74 = vector.shape_cast %73 : vector<8xf32> to vector<8x1xf32>
    %cst_41 = arith.constant 3.200000e+01 : f32
    %75 = vector.broadcast %cst_41 : f32 to vector<8x1xf32>
    %76 = arith.divf %74, %75 : vector<8x1xf32>
    %77 = vector.broadcast %76 : vector<8x1xf32> to vector<8x32xf32>
    %78 = arith.subf %68, %77 : vector<8x32xf32>
    %79 = arith.mulf %78, %78 : vector<8x32xf32>
    %cst_42 = arith.constant dense<0.000000e+00> : vector<8xf32>
    %80 = vector.multi_reduction <add>, %79, %cst_42 [1] : vector<8x32xf32> to vector<8xf32>
    %81 = vector.shape_cast %80 : vector<8xf32> to vector<8x1xf32>
    %cst_43 = arith.constant 3.200000e+01 : f32
    %82 = vector.broadcast %cst_43 : f32 to vector<8x1xf32>
    %83 = arith.divf %81, %82 : vector<8x1xf32>
    %84 = vector.broadcast %76 : vector<8x1xf32> to vector<8x32xf32>
    %85 = arith.subf %68, %84 : vector<8x32xf32>
    %cst_44 = arith.constant 9.99999996E-13 : f32
    %86 = vector.broadcast %cst_44 : f32 to vector<8x1xf32>
    %87 = arith.addf %83, %86 : vector<8x1xf32>
    %88 = math.rsqrt %87 : vector<8x1xf32>
    %89 = vector.broadcast %88 : vector<8x1xf32> to vector<8x32xf32>
    %90 = arith.mulf %85, %89 : vector<8x32xf32>
    %91 = vector.broadcast %70 : vector<1x32xf32> to vector<8x32xf32>
    %92 = arith.mulf %90, %91 : vector<8x32xf32>
    %93 = vector.broadcast %72 : vector<1x32xf32> to vector<8x32xf32>
    %94 = arith.addf %92, %93 : vector<8x32xf32>
    %95 = arith.truncf %94 : vector<8x32xf32> to vector<8x32xbf16>
    %c0_45 = arith.constant 0 : index
    %c0_46 = arith.constant 0 : index
    %c0_47 = arith.constant 0 : index
    %96 = vector.load %arg11[%c0_45, %c0_46, %c0_47] : memref<2x32x64xbf16, #tpu.memory_space<vmem>>, vector<1x32x64xbf16>
    %97 = vector.shape_cast %96 : vector<1x32x64xbf16> to vector<32x64xbf16>
    %cst_48 = arith.constant dense<0.000000e+00> : vector<8x64xf32>
    %98 = tpu.matmul %95, %97, %cst_48 {dimension_numbers = #tpu.dot_dimension_numbers<[1], [0], [0], [1], [0, 0, 1, 1], [], []>} : vector<8x32xbf16>, vector<32x64xbf16>, vector<8x64xf32> -> vector<8x64xf32>
    %c0_49 = arith.constant 0 : index
    %c0_50 = arith.constant 0 : index
    %c0_51 = arith.constant 0 : index
    %99 = vector.load %arg12[%c0_49, %c0_50, %c0_51] : memref<2x1x64xf32, #tpu.memory_space<vmem>>, vector<1x1x64xf32>
    %100 = vector.shape_cast %99 : vector<1x1x64xf32> to vector<1x64xf32>
    %101 = vector.broadcast %100 : vector<1x64xf32> to vector<8x64xf32>
    %102 = arith.addf %98, %101 : vector<8x64xf32>
    %cst_52 = arith.constant 5.000000e-01 : f32
    %103 = vector.broadcast %cst_52 : f32 to vector<8x64xf32>
    %104 = arith.mulf %103, %102 : vector<8x64xf32>
    %cst_53 = arith.constant 0.707106769 : f32
    %105 = vector.broadcast %cst_53 : f32 to vector<8x64xf32>
    %106 = arith.mulf %102, %105 : vector<8x64xf32>
    %107 = math.erf %106 : vector<8x64xf32>
    %cst_54 = arith.constant 1.000000e+00 : f32
    %108 = vector.broadcast %cst_54 : f32 to vector<8x64xf32>
    %109 = arith.addf %108, %107 : vector<8x64xf32>
    %110 = arith.mulf %104, %109 : vector<8x64xf32>
    %111 = arith.truncf %110 : vector<8x64xf32> to vector<8x64xbf16>
    %c0_55 = arith.constant 0 : index
    %c0_56 = arith.constant 0 : index
    %c0_57 = arith.constant 0 : index
    %112 = vector.load %arg13[%c0_55, %c0_56, %c0_57] : memref<2x64x32xbf16, #tpu.memory_space<vmem>>, vector<1x64x32xbf16>
    %113 = vector.shape_cast %112 : vector<1x64x32xbf16> to vector<64x32xbf16>
    %cst_58 = arith.constant dense<0.000000e+00> : vector<8x32xf32>
    %114 = tpu.matmul %111, %113, %cst_58 {dimension_numbers = #tpu.dot_dimension_numbers<[1], [0], [0], [1], [0, 0, 1, 1], [], []>} : vector<8x64xbf16>, vector<64x32xbf16>, vector<8x32xf32> -> vector<8x32xf32>
    %c0_59 = arith.constant 0 : index
    %c0_60 = arith.constant 0 : index
    %c0_61 = arith.constant 0 : index
    %115 = vector.load %arg14[%c0_59, %c0_60, %c0_61] : memref<2x1x32xf32, #tpu.memory_space<vmem>>, vector<1x1x32xf32>
    %116 = vector.shape_cast %115 : vector<1x1x32xf32> to vector<1x32xf32>
    %117 = vector.broadcast %116 : vector<1x32xf32> to vector<8x32xf32>
    %118 = arith.addf %114, %117 : vector<8x32xf32>
    %119 = arith.addf %118, %94 : vector<8x32xf32>
    %c0_62 = arith.constant 0 : index
    %c0_63 = arith.constant 0 : index
    %c0_64 = arith.constant 0 : index
    %120 = vector.load %arg15[%c0_62, %c0_63, %c0_64] : memref<2x1x32xf32, #tpu.memory_space<vmem>>, vector<1x1x32xf32>
    %121 = vector.shape_cast %120 : vector<1x1x32xf32> to vector<1x32xf32>
    %c0_65 = arith.constant 0 : index
    %c0_66 = arith.constant 0 : index
    %c0_67 = arith.constant 0 : index
    %122 = vector.load %arg16[%c0_65, %c0_66, %c0_67] : memref<2x1x32xf32, #tpu.memory_space<vmem>>, vector<1x1x32xf32>
    %123 = vector.shape_cast %122 : vector<1x1x32xf32> to vector<1x32xf32>
    %cst_68 = arith.constant dense<0.000000e+00> : vector<8xf32>
    %124 = vector.multi_reduction <add>, %119, %cst_68 [1] : vector<8x32xf32> to vector<8xf32>
    %125 = vector.shape_cast %124 : vector<8xf32> to vector<8x1xf32>
    %cst_69 = arith.constant 3.200000e+01 : f32
    %126 = vector.broadcast %cst_69 : f32 to vector<8x1xf32>
    %127 = arith.divf %125, %126 : vector<8x1xf32>
    %128 = vector.broadcast %127 : vector<8x1xf32> to vector<8x32xf32>
    %129 = arith.subf %119, %128 : vector<8x32xf32>
    %130 = arith.mulf %129, %129 : vector<8x32xf32>
    %cst_70 = arith.constant dense<0.000000e+00> : vector<8xf32>
    %131 = vector.multi_reduction <add>, %130, %cst_70 [1] : vector<8x32xf32> to vector<8xf32>
    %132 = vector.shape_cast %131 : vector<8xf32> to vector<8x1xf32>
    %cst_71 = arith.constant 3.200000e+01 : f32
    %133 = vector.broadcast %cst_71 : f32 to vector<8x1xf32>
    %134 = arith.divf %132, %133 : vector<8x1xf32>
    %135 = vector.broadcast %127 : vector<8x1xf32> to vector<8x32xf32>
    %136 = arith.subf %119, %135 : vector<8x32xf32>
    %cst_72 = arith.constant 9.99999996E-13 : f32
    %137 = vector.broadcast %cst_72 : f32 to vector<8x1xf32>
    %138 = arith.addf %134, %137 : vector<8x1xf32>
    %139 = math.rsqrt %138 : vector<8x1xf32>
    %140 = vector.broadcast %139 : vector<8x1xf32> to vector<8x32xf32>
    %141 = arith.mulf %136, %140 : vector<8x32xf32>
    %142 = vector.broadcast %121 : vector<1x32xf32> to vector<8x32xf32>
    %143 = arith.mulf %141, %142 : vector<8x32xf32>
    %144 = vector.broadcast %123 : vector<1x32xf32> to vector<8x32xf32>
    %145 = arith.addf %143, %144 : vector<8x32xf32>
    %146 = arith.truncf %145 : vector<8x32xf32> to vector<8x32xbf16>
    %c1 = arith.constant 1 : index
    %c0_73 = arith.constant 0 : index
    %c0_74 = arith.constant 0 : index
    %147 = vector.load %arg5[%c1, %c0_73, %c0_74] : memref<2x32x96xbf16, #tpu.memory_space<vmem>>, vector<1x32x96xbf16>
    %148 = vector.shape_cast %147 : vector<1x32x96xbf16> to vector<32x96xbf16>
    %cst_75 = arith.constant dense<0.000000e+00> : vector<8x96xf32>
    %149 = tpu.matmul %146, %148, %cst_75 {dimension_numbers = #tpu.dot_dimension_numbers<[1], [0], [0], [1], [0, 0, 1, 1], [], []>} : vector<8x32xbf16>, vector<32x96xbf16>, vector<8x96xf32> -> vector<8x96xf32>
    %c1_76 = arith.constant 1 : index
    %c0_77 = arith.constant 0 : index
    %c0_78 = arith.constant 0 : index
    %150 = vector.load %arg6[%c1_76, %c0_77, %c0_78] : memref<2x1x96xf32, #tpu.memory_space<vmem>>, vector<1x1x96xf32>
    %151 = vector.shape_cast %150 : vector<1x1x96xf32> to vector<1x96xf32>
    %152 = vector.broadcast %151 : vector<1x96xf32> to vector<8x96xf32>
    %153 = arith.addf %149, %152 : vector<8x96xf32>
    %154 = vector.shape_cast %153 : vector<8x96xf32> to vector<8x12x8xf32>
    %155 = tpu.transpose %154, [1, 0, 2] : vector<8x12x8xf32> -> vector<12x8x8xf32>
    %156 = vector.extract_strided_slice %155 {offsets = [0, 0, 0], sizes = [4, 8, 8], strides = [1, 1, 1]} : vector<12x8x8xf32> to vector<4x8x8xf32>
    %157 = arith.truncf %156 : vector<4x8x8xf32> to vector<4x8x8xbf16>
    %158 = vector.extract_strided_slice %155 {offsets = [4, 0, 0], sizes = [4, 8, 8], strides = [1, 1, 1]} : vector<12x8x8xf32> to vector<4x8x8xf32>
    %159 = arith.truncf %158 : vector<4x8x8xf32> to vector<4x8x8xbf16>
    %160 = vector.extract_strided_slice %155 {offsets = [8, 0, 0], sizes = [4, 8, 8], strides = [1, 1, 1]} : vector<12x8x8xf32> to vector<4x8x8xf32>
    %161 = arith.truncf %160 : vector<4x8x8xf32> to vector<4x8x8xbf16>
    "tpu.trace_start"() <{level = 10 : i32, message = "hqd,hkd->hqk"}> : () -> ()
    %cst_79 = arith.constant dense<0.000000e+00> : vector<4x8x8xf32>
    %162 = tpu.matmul %157, %159, %cst_79 {dimension_numbers = #tpu.dot_dimension_numbers<[2], [2], [1], [1], [0, 0, 0, 1, 1, 1], [0], [0]>} : vector<4x8x8xbf16>, vector<4x8x8xbf16>, vector<4x8x8xf32> -> vector<4x8x8xf32>
    "tpu.trace_stop"() : () -> ()
    %cst_80 = arith.constant 0.353553385 : f32
    %163 = vector.broadcast %cst_80 : f32 to vector<4x8x8xf32>
    %164 = arith.mulf %162, %163 : vector<4x8x8xf32>
    %165 = vector.broadcast %0 : vector<1x1x8xf32> to vector<4x8x8xf32>
    %166 = arith.addf %164, %165 : vector<4x8x8xf32>
    %cst_81 = arith.constant dense<0xFF800000> : vector<4x8xf32>
    %167 = vector.multi_reduction <maximumf>, %166, %cst_81 [2] : vector<4x8x8xf32> to vector<4x8xf32>
    %168 = vector.shape_cast %167 : vector<4x8xf32> to vector<4x8x1xf32>
    %169 = vector.broadcast %168 : vector<4x8x1xf32> to vector<4x8x8xf32>
    %170 = arith.subf %166, %169 : vector<4x8x8xf32>
    %171 = math.exp %170 : vector<4x8x8xf32>
    %cst_82 = arith.constant dense<0.000000e+00> : vector<4x8xf32>
    %172 = vector.multi_reduction <add>, %171, %cst_82 [2] : vector<4x8x8xf32> to vector<4x8xf32>
    %173 = vector.shape_cast %172 : vector<4x8xf32> to vector<4x8x1xf32>
    %174 = vector.broadcast %173 : vector<4x8x1xf32> to vector<4x8x8xf32>
    %175 = arith.divf %171, %174 : vector<4x8x8xf32>
    %176 = arith.truncf %175 : vector<4x8x8xf32> to vector<4x8x8xbf16>
    "tpu.trace_start"() <{level = 10 : i32, message = "hqk,hkd->hqd"}> : () -> ()
    %cst_83 = arith.constant dense<0.000000e+00> : vector<4x8x8xf32>
    %177 = tpu.matmul %176, %161, %cst_83 {dimension_numbers = #tpu.dot_dimension_numbers<[2], [1], [1], [2], [0, 0, 0, 1, 1, 2], [0], [0]>} : vector<4x8x8xbf16>, vector<4x8x8xbf16>, vector<4x8x8xf32> -> vector<4x8x8xf32>
    "tpu.trace_stop"() : () -> ()
    %178 = arith.truncf %177 : vector<4x8x8xf32> to vector<4x8x8xbf16>
    %c1_84 = arith.constant 1 : index
    %c0_85 = arith.constant 0 : index
    %c0_86 = arith.constant 0 : index
    %c0_87 = arith.constant 0 : index
    %179 = vector.load %arg7[%c1_84, %c0_85, %c0_86, %c0_87] : memref<2x4x8x32xbf16, #tpu.memory_space<vmem>>, vector<1x4x8x32xbf16>
    %180 = vector.shape_cast %179 : vector<1x4x8x32xbf16> to vector<4x8x32xbf16>
    "tpu.trace_start"() <{level = 10 : i32, message = "hsd,hdn->hsn"}> : () -> ()
    %cst_88 = arith.constant dense<0.000000e+00> : vector<4x8x32xf32>
    %181 = tpu.matmul %178, %180, %cst_88 {dimension_numbers = #tpu.dot_dimension_numbers<[2], [1], [1], [2], [0, 0, 0, 1, 1, 2], [0], [0]>} : vector<4x8x8xbf16>, vector<4x8x32xbf16>, vector<4x8x32xf32> -> vector<4x8x32xf32>
    "tpu.trace_stop"() : () -> ()
    %cst_89 = arith.constant dense<0.000000e+00> : vector<8x32xf32>
    %182 = vector.multi_reduction <add>, %181, %cst_89 [0] : vector<4x8x32xf32> to vector<8x32xf32>
    %c1_90 = arith.constant 1 : index
    %c0_91 = arith.constant 0 : index
    %c0_92 = arith.constant 0 : index
    %183 = vector.load %arg8[%c1_90, %c0_91, %c0_92] : memref<2x1x32xf32, #tpu.memory_space<vmem>>, vector<1x1x32xf32>
    %184 = vector.shape_cast %183 : vector<1x1x32xf32> to vector<1x32xf32>
    %185 = vector.broadcast %184 : vector<1x32xf32> to vector<8x32xf32>
    %186 = arith.addf %182, %185 : vector<8x32xf32>
    %187 = arith.addf %186, %145 : vector<8x32xf32>
    %c1_93 = arith.constant 1 : index
    %c0_94 = arith.constant 0 : index
    %c0_95 = arith.constant 0 : index
    %188 = vector.load %arg9[%c1_93, %c0_94, %c0_95] : memref<2x1x32xf32, #tpu.memory_space<vmem>>, vector<1x1x32xf32>
    %189 = vector.shape_cast %188 : vector<1x1x32xf32> to vector<1x32xf32>
    %c1_96 = arith.constant 1 : index
    %c0_97 = arith.constant 0 : index
    %c0_98 = arith.constant 0 : index
    %190 = vector.load %arg10[%c1_96, %c0_97, %c0_98] : memref<2x1x32xf32, #tpu.memory_space<vmem>>, vector<1x1x32xf32>
    %191 = vector.shape_cast %190 : vector<1x1x32xf32> to vector<1x32xf32>
    %cst_99 = arith.constant dense<0.000000e+00> : vector<8xf32>
    %192 = vector.multi_reduction <add>, %187, %cst_99 [1] : vector<8x32xf32> to vector<8xf32>
    %193 = vector.shape_cast %192 : vector<8xf32> to vector<8x1xf32>
    %cst_100 = arith.constant 3.200000e+01 : f32
    %194 = vector.broadcast %cst_100 : f32 to vector<8x1xf32>
    %195 = arith.divf %193, %194 : vector<8x1xf32>
    %196 = vector.broadcast %195 : vector<8x1xf32> to vector<8x32xf32>
    %197 = arith.subf %187, %196 : vector<8x32xf32>
    %198 = arith.mulf %197, %197 : vector<8x32xf32>
    %cst_101 = arith.constant dense<0.000000e+00> : vector<8xf32>
    %199 = vector.multi_reduction <add>, %198, %cst_101 [1] : vector<8x32xf32> to vector<8xf32>
    %200 = vector.shape_cast %199 : vector<8xf32> to vector<8x1xf32>
    %cst_102 = arith.constant 3.200000e+01 : f32
    %201 = vector.broadcast %cst_102 : f32 to vector<8x1xf32>
    %202 = arith.divf %200, %201 : vector<8x1xf32>
    %203 = vector.broadcast %195 : vector<8x1xf32> to vector<8x32xf32>
    %204 = arith.subf %187, %203 : vector<8x32xf32>
    %cst_103 = arith.constant 9.99999996E-13 : f32
    %205 = vector.broadcast %cst_103 : f32 to vector<8x1xf32>
    %206 = arith.addf %202, %205 : vector<8x1xf32>
    %207 = math.rsqrt %206 : vector<8x1xf32>
    %208 = vector.broadcast %207 : vector<8x1xf32> to vector<8x32xf32>
    %209 = arith.mulf %204, %208 : vector<8x32xf32>
    %210 = vector.broadcast %189 : vector<1x32xf32> to vector<8x32xf32>
    %211 = arith.mulf %209, %210 : vector<8x32xf32>
    %212 = vector.broadcast %191 : vector<1x32xf32> to vector<8x32xf32>
    %213 = arith.addf %211, %212 : vector<8x32xf32>
    %214 = arith.truncf %213 : vector<8x32xf32> to vector<8x32xbf16>
    %c1_104 = arith.constant 1 : index
    %c0_105 = arith.constant 0 : index
    %c0_106 = arith.constant 0 : index
    %215 = vector.load %arg11[%c1_104, %c0_105, %c0_106] : memref<2x32x64xbf16, #tpu.memory_space<vmem>>, vector<1x32x64xbf16>
    %216 = vector.shape_cast %215 : vector<1x32x64xbf16> to vector<32x64xbf16>
    %cst_107 = arith.constant dense<0.000000e+00> : vector<8x64xf32>
    %217 = tpu.matmul %214, %216, %cst_107 {dimension_numbers = #tpu.dot_dimension_numbers<[1], [0], [0], [1], [0, 0, 1, 1], [], []>} : vector<8x32xbf16>, vector<32x64xbf16>, vector<8x64xf32> -> vector<8x64xf32>
    %c1_108 = arith.constant 1 : index
    %c0_109 = arith.constant 0 : index
    %c0_110 = arith.constant 0 : index
    %218 = vector.load %arg12[%c1_108, %c0_109, %c0_110] : memref<2x1x64xf32, #tpu.memory_space<vmem>>, vector<1x1x64xf32>
    %219 = vector.shape_cast %218 : vector<1x1x64xf32> to vector<1x64xf32>
    %220 = vector.broadcast %219 : vector<1x64xf32> to vector<8x64xf32>
    %221 = arith.addf %217, %220 : vector<8x64xf32>
    %cst_111 = arith.constant 5.000000e-01 : f32
    %222 = vector.broadcast %cst_111 : f32 to vector<8x64xf32>
    %223 = arith.mulf %222, %221 : vector<8x64xf32>
    %cst_112 = arith.constant 0.707106769 : f32
    %224 = vector.broadcast %cst_112 : f32 to vector<8x64xf32>
    %225 = arith.mulf %221, %224 : vector<8x64xf32>
    %226 = math.erf %225 : vector<8x64xf32>
    %cst_113 = arith.constant 1.000000e+00 : f32
    %227 = vector.broadcast %cst_113 : f32 to vector<8x64xf32>
    %228 = arith.addf %227, %226 : vector<8x64xf32>
    %229 = arith.mulf %223, %228 : vector<8x64xf32>
    %230 = arith.truncf %229 : vector<8x64xf32> to vector<8x64xbf16>
    %c1_114 = arith.constant 1 : index
    %c0_115 = arith.constant 0 : index
    %c0_116 = arith.constant 0 : index
    %231 = vector.load %arg13[%c1_114, %c0_115, %c0_116] : memref<2x64x32xbf16, #tpu.memory_space<vmem>>, vector<1x64x32xbf16>
    %232 = vector.shape_cast %231 : vector<1x64x32xbf16> to vector<64x32xbf16>
    %cst_117 = arith.constant dense<0.000000e+00> : vector<8x32xf32>
    %233 = tpu.matmul %230, %232, %cst_117 {dimension_numbers = #tpu.dot_dimension_numbers<[1], [0], [0], [1], [0, 0, 1, 1], [], []>} : vector<8x64xbf16>, vector<64x32xbf16>, vector<8x32xf32> -> vector<8x32xf32>
    %c1_118 = arith.constant 1 : index
    %c0_119 = arith.constant 0 : index
    %c0_120 = arith.constant 0 : index
    %234 = vector.load %arg14[%c1_118, %c0_119, %c0_120] : memref<2x1x32xf32, #tpu.memory_space<vmem>>, vector<1x1x32xf32>
    %235 = vector.shape_cast %234 : vector<1x1x32xf32> to vector<1x32xf32>
    %236 = vector.broadcast %235 : vector<1x32xf32> to vector<8x32xf32>
    %237 = arith.addf %233, %236 : vector<8x32xf32>
    %238 = arith.addf %237, %213 : vector<8x32xf32>
    %c1_121 = arith.constant 1 : index
    %c0_122 = arith.constant 0 : index
    %c0_123 = arith.constant 0 : index
    %239 = vector.load %arg15[%c1_121, %c0_122, %c0_123] : memref<2x1x32xf32, #tpu.memory_space<vmem>>, vector<1x1x32xf32>
    %240 = vector.shape_cast %239 : vector<1x1x32xf32> to vector<1x32xf32>
    %c1_124 = arith.constant 1 : index
    %c0_125 = arith.constant 0 : index
    %c0_126 = arith.constant 0 : index
    %241 = vector.load %arg16[%c1_124, %c0_125, %c0_126] : memref<2x1x32xf32, #tpu.memory_space<vmem>>, vector<1x1x32xf32>
    %242 = vector.shape_cast %241 : vector<1x1x32xf32> to vector<1x32xf32>
    %cst_127 = arith.constant dense<0.000000e+00> : vector<8xf32>
    %243 = vector.multi_reduction <add>, %238, %cst_127 [1] : vector<8x32xf32> to vector<8xf32>
    %244 = vector.shape_cast %243 : vector<8xf32> to vector<8x1xf32>
    %cst_128 = arith.constant 3.200000e+01 : f32
    %245 = vector.broadcast %cst_128 : f32 to vector<8x1xf32>
    %246 = arith.divf %244, %245 : vector<8x1xf32>
    %247 = vector.broadcast %246 : vector<8x1xf32> to vector<8x32xf32>
    %248 = arith.subf %238, %247 : vector<8x32xf32>
    %249 = arith.mulf %248, %248 : vector<8x32xf32>
    %cst_129 = arith.constant dense<0.000000e+00> : vector<8xf32>
    %250 = vector.multi_reduction <add>, %249, %cst_129 [1] : vector<8x32xf32> to vector<8xf32>
    %251 = vector.shape_cast %250 : vector<8xf32> to vector<8x1xf32>
    %cst_130 = arith.constant 3.200000e+01 : f32
    %252 = vector.broadcast %cst_130 : f32 to vector<8x1xf32>
    %253 = arith.divf %251, %252 : vector<8x1xf32>
    %254 = vector.broadcast %246 : vector<8x1xf32> to vector<8x32xf32>
    %255 = arith.subf %238, %254 : vector<8x32xf32>
    %cst_131 = arith.constant 9.99999996E-13 : f32
    %256 = vector.broadcast %cst_131 : f32 to vector<8x1xf32>
    %257 = arith.addf %253, %256 : vector<8x1xf32>
    %258 = math.rsqrt %257 : vector<8x1xf32>
    %259 = vector.broadcast %258 : vector<8x1xf32> to vector<8x32xf32>
    %260 = arith.mulf %255, %259 : vector<8x32xf32>
    %261 = vector.broadcast %240 : vector<1x32xf32> to vector<8x32xf32>
    %262 = arith.mulf %260, %261 : vector<8x32xf32>
    %263 = vector.broadcast %242 : vector<1x32xf32> to vector<8x32xf32>
    %264 = arith.addf %262, %263 : vector<8x32xf32>
    %c0_132 = arith.constant 0 : index
    %c0_133 = arith.constant 0 : index
    %c0_134 = arith.constant 0 : index
    %265 = vector.load %arg17[%c0_132, %c0_133, %c0_134] : memref<1x8x32xf32, #tpu.memory_space<vmem>>, vector<1x8x32xf32>
    %266 = vector.shape_cast %265 : vector<1x8x32xf32> to vector<8x32xf32>
    %267 = vector.shape_cast %264 : vector<8x32xf32> to vector<1x8x32xf32>
    tpu.vector_store %arg17[%c0_132, %c0_133, %c0_134], %267 {strides = array<i32>} : memref<1x8x32xf32, #tpu.memory_space<vmem>>, vector<1x8x32xf32>,
    return
  }
  func.func @transform_0(%arg0: i32) -> (i32, i32, i32) {
    %c0_i32 = arith.constant 0 : i32
    %c0_i32_0 = arith.constant 0 : i32
    %c0_i32_1 = arith.constant 0 : i32
    return %arg0, %c0_i32, %c0_i32_0 : i32, i32, i32
  }
  func.func @transform_1(%arg0: i32) -> (i32, i32, i32) {
    %c0_i32 = arith.constant 0 : i32
    %c0_i32_0 = arith.constant 0 : i32
    %c0_i32_1 = arith.constant 0 : i32
    return %arg0, %c0_i32, %c0_i32_0 : i32, i32, i32
  }
  func.func @transform_2(%arg0: i32) -> (i32, i32) {
    %c0_i32 = arith.constant 0 : i32
    %c0_i32_0 = arith.constant 0 : i32
    %c0_i32_1 = arith.constant 0 : i32
    return %c0_i32, %c0_i32_0 : i32, i32
  }
  func.func @transform_3(%arg0: i32) -> (i32, i32) {
    %c0_i32 = arith.constant 0 : i32
    %c0_i32_0 = arith.constant 0 : i32
    %c0_i32_1 = arith.constant 0 : i32
    return %c0_i32, %c0_i32_0 : i32, i32
  }
  func.func @transform_4(%arg0: i32) -> (i32, i32, i32) {
    %c0_i32 = arith.constant 0 : i32
    %c0_i32_0 = arith.constant 0 : i32
    %c0_i32_1 = arith.constant 0 : i32
    %c0_i32_2 = arith.constant 0 : i32
    return %c0_i32, %c0_i32_0, %c0_i32_1 : i32, i32, i32
  }
  func.func @transform_5(%arg0: i32) -> (i32, i32, i32) {
    %c0_i32 = arith.constant 0 : i32
    %c0_i32_0 = arith.constant 0 : i32
    %c0_i32_1 = arith.constant 0 : i32
    %c0_i32_2 = arith.constant 0 : i32
    return %c0_i32, %c0_i32_0, %c0_i32_1 : i32, i32, i32
  }
  func.func @transform_6(%arg0: i32) -> (i32, i32, i32, i32) {
    %c0_i32 = arith.constant 0 : i32
    %c0_i32_0 = arith.constant 0 : i32
    %c0_i32_1 = arith.constant 0 : i32
    %c0_i32_2 = arith.constant 0 : i32
    %c0_i32_3 = arith.constant 0 : i32
    return %c0_i32, %c0_i32_0, %c0_i32_1, %c0_i32_2 : i32, i32, i32, i32
  }
  func.func @transform_7(%arg0: i32) -> (i32, i32, i32) {
    %c0_i32 = arith.constant 0 : i32
    %c0_i32_0 = arith.constant 0 : i32
    %c0_i32_1 = arith.constant 0 : i32
    %c0_i32_2 = arith.constant 0 : i32
    return %c0_i32, %c0_i32_0, %c0_i32_1 : i32, i32, i32
  }
  func.func @transform_8(%arg0: i32) -> (i32, i32, i32) {
    %c0_i32 = arith.constant 0 : i32
    %c0_i32_0 = arith.constant 0 : i32
    %c0_i32_1 = arith.constant 0 : i32
    %c0_i32_2 = arith.constant 0 : i32
    return %c0_i32, %c0_i32_0, %c0_i32_1 : i32, i32, i32
  }
  func.func @transform_9(%arg0: i32) -> (i32, i32, i32) {
    %c0_i32 = arith.constant 0 : i32
    %c0_i32_0 = arith.constant 0 : i32
    %c0_i32_1 = arith.constant 0 : i32
    %c0_i32_2 = arith.constant 0 : i32
    return %c0_i32, %c0_i32_0, %c0_i32_1 : i32, i32, i32
  }
  func.func @transform_10(%arg0: i32) -> (i32, i32, i32) {
    %c0_i32 = arith.constant 0 : i32
    %c0_i32_0 = arith.constant 0 : i32
    %c0_i32_1 = arith.constant 0 : i32
    %c0_i32_2 = arith.constant 0 : i32
    return %c0_i32, %c0_i32_0, %c0_i32_1 : i32, i32, i32
  }
  func.func @transform_11(%arg0: i32) -> (i32, i32, i32) {
    %c0_i32 = arith.constant 0 : i32
    %c0_i32_0 = arith.constant 0 : i32
    %c0_i32_1 = arith.constant 0 : i32
    %c0_i32_2 = arith.constant 0 : i32
    return %c0_i32, %c0_i32_0, %c0_i32_1 : i32, i32, i32
  }
  func.func @transform_12(%arg0: i32) -> (i32, i32, i32) {
    %c0_i32 = arith.constant 0 : i32
    %c0_i32_0 = arith.constant 0 : i32
    %c0_i32_1 = arith.constant 0 : i32
    %c0_i32_2 = arith.constant 0 : i32
    return %c0_i32, %c0_i32_0, %c0_i32_1 : i32, i32, i32
  }
  func.func @transform_13(%arg0: i32) -> (i32, i32, i32) {
    %c0_i32 = arith.constant 0 : i32
    %c0_i32_0 = arith.constant 0 : i32
    %c0_i32_1 = arith.constant 0 : i32
    %c0_i32_2 = arith.constant 0 : i32
    return %c0_i32, %c0_i32_0, %c0_i32_1 : i32, i32, i32
  }
  func.func @transform_14(%arg0: i32) -> (i32, i32, i32) {
    %c0_i32 = arith.constant 0 : i32
    %c0_i32_0 = arith.constant 0 : i32
    %c0_i32_1 = arith.constant 0 : i32
    %c0_i32_2 = arith.constant 0 : i32
    return %c0_i32, %c0_i32_0, %c0_i32_1 : i32, i32, i32
  }
  func.func @transform_15(%arg0: i32) -> (i32, i32, i32) {
    %c0_i32 = arith.constant 0 : i32
    %c0_i32_0 = arith.constant 0 : i32
    %c0_i32_1 = arith.constant 0 : i32
    %c0_i32_2 = arith.constant 0 : i32
    return %c0_i32, %c0_i32_0, %c0_i32_1 : i32, i32, i32
  }
  func.func @transform_16(%arg0: i32) -> (i32, i32, i32) {
    %c0_i32 = arith.constant 0 : i32
    %c0_i32_0 = arith.constant 0 : i32
    %c0_i32_1 = arith.constant 0 : i32
    return %arg0, %c0_i32, %c0_i32_0 : i32, i32, i32
  }
}

</mosaic_0001>

<bundles_post_ra>
// kernel: bert_classifier_forward.1
= control target key start
LH: loop header
LB: loop body
LE: loop exit
PB: predicated region body
PF: predicated region fallthrough
CT: control target
= control target key end

     0   :  { %s2948_s21 = smov 0   ;;  %s3555_s0 = inlined_call_operand.vmem [shape: f32[2,8,32], index: 0, kind: input, shape index: {}]   ;;  %s3556_s1 = inlined_call_operand.vmem [shape: f32[2,1,8], index: 1, kind: input, shape index: {}]   ;;  %s3557_s2 = inlined_call_operand.vmem [shape: f32[1,32], index: 2, kind: input, shape index: {}]   ;;  %s3558_s3 = inlined_call_operand.vmem [shape: f32[1,32], index: 3, kind: input, shape index: {}]   ;;  %s3559_s4 = inlined_call_operand.vmem [shape: bf16[2,32,96], index: 4, kind: input, shape index: {}]   ;;  %s3560_s5 = inlined_call_operand.vmem [shape: f32[2,1,96], index: 5, kind: input, shape index: {}]   ;;  %s3561_s6 = inlined_call_operand.vmem [shape: bf16[2,4,8,32], index: 6, kind: input, shape index: {}]   ;;  %s3562_s7 = inlined_call_operand.vmem [shape: f32[2,1,32], index: 7, kind: input, shape index: {}]   ;;  %s3563_s8 = inlined_call_operand.vmem [shape: f32[2,1,32], index: 8, kind: input, shape index: {}]   ;;  %s3564_s9 = inlined_call_operand.vmem [shape: f32[2,1,32], index: 9, kind: input, shape index: {}]   ;;  %s3565_s10 = inlined_call_operand.vmem [shape: bf16[2,32,64], index: 10, kind: input, shape index: {}]   ;;  %s3566_s11 = inlined_call_operand.vmem [shape: f32[2,1,64], index: 11, kind: input, shape index: {}]   ;;  %s3567_s12 = inlined_call_operand.vmem [shape: bf16[2,64,32], index: 12, kind: input, shape index: {}]   ;;  %s3568_s13 = inlined_call_operand.vmem [shape: f32[2,1,32], index: 13, kind: input, shape index: {}]   ;;  %s3569_s14 = inlined_call_operand.vmem [shape: f32[2,1,32], index: 14, kind: input, shape index: {}]   ;;  %s3570_s15 = inlined_call_operand.vmem [shape: f32[2,1,32], index: 15, kind: input, shape index: {}]   ;;  %s3571_s16 = inlined_call_operand.vmem [shape: f32[2,8,32], index: 16, kind: output, shape index: {}]  }
   0x1   :  { %3579 = sst [smem:[#allocation2_spill]] %s3555_s0 }
   0x2 LB: > { %s2602_s22 = sadd.s32 4294967295, %s2847_s21   ;;  %p2606_p0 = scmp.ge.s32.totalorder %s2847_s21, 1  ;;  %s2847_s21 = sphi %s2948_s21, %s26_s21  }
   0x3   : > { %p469_p1 = scmp.lt.s32.totalorder %s2847_s21, 3 }
   0x5   : > { %p470_p2 = pnand %p2606_p0, %p469_p1 }
   0x6   : > { %p520_p3 = scmp.lt.s32.totalorder (!%p470_p2), %s2602_s22, 1  ;;  %s3580_s29 = sld [smem:[#allocation2_spill]] (!%p470_p2) }
   0x7   : > { %473 = sbr.rel (%p470_p2) target bundleno = 3946 (0xf6a), region = 84  ;;  %s3576_s0 = smov (!%p470_p2), 112  }
   0x8   : > { %s2852_s17 = smov (!%p470_p2), 104   ;;  %s2853_s18 = smov (!%p470_p2), 88  }
   0x9   : > { %s2854_s19 = smov (!%p470_p2), 120   ;;  %s2855_s20 = smov (!%p470_p2), 80  }
   0xa   : > { %s2856_s24 = smov (!%p470_p2), 96   ;;  %s3573_s25 = smov (!%p470_p2), 48  }
   0xb   : > { %s3574_s27 = smov (!%p470_p2), 40   ;;  %s3575_s28 = smov (!%p470_p2), 56  }
   0xc   : > { %s3589_s22 = smov (!%p520_p3, %s2602_s22), 1  ;;  %vm536_vm0 = vcmask 261120   ;;  %v2849_v2 = vmov 32.0   ;;  %v2736_v14 = vld [vmem:[%s3559_s4 + $0x8] sm:$0xff]  ;;  %v2735_v15 = vld [vmem:[%s3559_s4] sm:$0xff]  ;;  %vm646_vm5 = vcmask 1047556  }
   0xd   : > { %s3572_s23 = sshll.u32 %s3589_s22, 3  ;;  %s2963_s26 = scalar_lea.vmem %s3556_s1, %s3589_s22  ;;  %2792 = vrcp.f32 %v2849_v2  ;;  %604 = vmatpush.bf16.msra.mxu0 %v2736_v14  ;;  %v2774_v25 = vld [vmem:[%s3557_s2] ss:$0 sm:$0xff]  ;;  %v2858_v40 = vmov 1983009808   ;;  %vm992_vm6 = vcmask 64512  }
   0xe   : > { %s523_s30 = scalar_lea.vmem %s3580_s29, %s3572_s23  ;;  %v2775_v28 = vld [vmem:[%s3558_s3] ss:$0 sm:$0xff]  ;;  %v651_v41 = vunpack.c.l.s4 %v2858_v40  ;;  %v2859_v54 = vmov 1934713408   ;;  %s3577_s29 = smov 64   ;;  %vm1183_vm7 = vcmask 1043456  }
   0xf   : > { %v533_v0 = vld [vmem:[%s523_s30] sm:$0xff]  ;;  %s3578_s30 = smov 72   ;;  %v699_v55 = vunpack.c.l.s4 %v2859_v54 }
  0x10   : > { %v537_v1 = vsel %vm536_vm0, %v533_v0, 0.0  ;;  %v2776_v32 = vld [vmem:[%s3560_s5] ss:$0 sm:$0xff]  ;;  %v3016_v45 = vunpack.c.0.s8 %v651_v41 }
  0x11   : > { %538 = vadd.xlane.f32.xlu0 %v537_v1  ;;  %605 = vmatpush.bf16.msra.mxu0 %v2735_v15  ;;  %v3029_v2 = vunpack.c.0.s8 %v699_v55 }
  0x13   : > { %v2793_v3 = vpop.eup %2792 }
  0x14   : > { %v541_v4 = vmul.f32 32.0, %v2793_v3  ;;  %vm545_vm1 = vweird.f32 %v2793_v3 }
  0x16   : > { %v542_v5 = vsub.f32 1.0, %v541_v4 }
  0x18   : > { %v543_v6 = vmul.f32 %v2793_v3, %v542_v5 }
  0x1a   : > { %v544_v7 = vadd.f32 %v2793_v3, %v543_v6 }
  0x1c   : > { %v2971_v8 = vsel %vm545_vm1, %v2793_v3, %v544_v7 }
  0x84   : > { %v539_v9 = vpop.xlane.xlu0 %538 }
  0x85   : > { %v547_v10 = vmul.f32 %v2971_v8, %v539_v9 }
  0x87   : > { %v548_v11 = vsub.f32 %v533_v0, %v547_v10 }
  0x89   : > { %v549_v12 = vmul.f32 %v548_v11, %v548_v11 }
  0x8b   : > { %v550_v13 = vsel %vm536_vm0, %v549_v12, 0.0 }
  0x8c   : > { %551 = vadd.xlane.f32.xlu0 %v550_v13 }
  0xff   : > { %v552_v16 = vpop.xlane.xlu0 %551 }
 0x100   : > { %v553_v17 = vmul.f32 %v552_v16, %v2971_v8 }
 0x102   : > { %v554_v18 = vadd.f32 1e-12, %v553_v17 }
 0x104   : > { %2794 = vrsqrt.f32 %v554_v18  ;;  %vm561_vm3 = vweird.f32 %v554_v18 }
 0x10a   : > { %v2795_v19 = vpop.eup %2794 }
 0x10b   : > { %v556_v20 = vmul.f32 %v2795_v19, %v554_v18  ;;  %vm562_vm2 = vweird.f32 %v2795_v19 }
 0x10c   : > { %vm563_vm4 = vmor %vm561_vm3, %vm562_vm2 }
 0x10d   : > { %v557_v21 = vmul.f32 %v2795_v19, %v556_v20 }
 0x10f   : > { %v558_v22 = vmul.f32 0.5, %v557_v21 }
 0x111   : > { %v559_v23 = vsub.f32 1.5, %v558_v22 }
 0x113   : > { %v560_v24 = vmul.f32 %v2795_v19, %v559_v23 }
 0x115   : > { %v564_v26 = vsel %vm563_vm4, %v2795_v19, %v560_v24 }
 0x116   : > { %v565_v27 = vmul.f32 %v564_v26, %v548_v11 }
 0x118   : > { %v569_v29 = vmul.f32 %v2774_v25, %v565_v27 }
 0x11a   : > { %v2988_v30 = vadd.f32 %v2775_v28, %v569_v29 }
 0x11c   : > { %v574_v31 = vpack.c.bf16 %v2988_v30, %v2988_v30 }
 0x11e   : > { %2617 = vmatmul.msk.bf16.vlgmr.msra.gmra.mxu0 %vm536_vm0, %v574_v31 }
 0x19b   : > { %v607_v33 = vpop.f32.mrf.mxu0 }
 0x19c   : > { %v2996_v34 = vadd.f32 %v2776_v32, %v607_v33 }
 0x19e   : > { %630 = vrot.lane.b32.xlu0 %v2996_v34, %s3578_s30  ;;  %615 = vrot.lane.b32.xlu2 %v2996_v34, %s3576_s0  ;;  %v648_v46 = vrot.slane %v2996_v34, 4 }
 0x19f   : > { %618 = vrot.lane.b32.xlu1 %v2996_v34, %s2852_s17 }
 0x1a3   : > { %v609_v35 = vpop.f32.mrf.mxu0 }
 0x1a6   : > { %624 = vrot.lane.b32.xlu2 %v2996_v34, %s2853_s18 }
 0x1a7   : > { %612 = vrot.lane.b32.xlu1 %v2996_v34, %s2854_s19 }
 0x1ae   : > { %627 = vrot.lane.b32.xlu2 %v2996_v34, %s2855_s20 }
 0x1af   : > { %621 = vrot.lane.b32.xlu1 %v2996_v34, %s2856_s24 }
 0x1b7   : > { %639 = vrot.lane.b32.xlu1 %v2996_v34, %s3573_s25 }
 0x1f8   : > { %v616_v36 = vpop.permute.xlu2 %615 }
 0x1f9   : > { %v645_v38 = vrot.slane %v616_v36, 4  ;;  %v649_v49 = vsel %vm646_vm5, %v616_v36, %v648_v46 }
 0x1fa   : > { %v657_v58 = vperm.slane %v649_v49, %v3016_v45 }
 0x1fb   : > { %v647_v43 = vsel %vm646_vm5, %v645_v38, %v2996_v34 }
 0x1fc   : > { %v653_v50 = vperm.slane %v647_v43, %v3016_v45  ;;  %v708_v7 = vrot.slane %v657_v58, 4 }
 0x1fe   : > { %v696_v63 = vrot.slane %v653_v50, 4 }
 0x200   : > { %v625_v39 = vpop.permute.xlu2 %624 }
 0x201   : > { %v684_v59 = vrot.slane %v625_v39, 4 }
 0x208   : > { %v628_v60 = vpop.permute.xlu2 %627 }
 0x209   : > { %v670_v4 = vrot.slane %v628_v60, 4 }
 0x210   : > { %v631_v42 = vpop.permute.xlu0 %630 }
 0x211   : > { %v619_v37 = vpop.permute.xlu1 %618  ;;  %v682_v44 = vrot.slane %v631_v42, 4  ;;  %v685_v1 = vsel %vm646_vm5, %v631_v42, %v684_v59 }
 0x212   : > { %v658_v47 = vrot.slane %v619_v37, 4  ;;  %v693_v10 = vperm.slane %v685_v1, %v3016_v45 }
 0x213   : > { %v683_v53 = vsel %vm646_vm5, %v682_v44, %v625_v39 }
 0x214   : > { %v689_v0 = vperm.slane %v683_v53, %v3016_v45  ;;  %v730_v23 = vrot.slane %v693_v10, 4 }
 0x216   : > { %v718_v11 = vrot.slane %v689_v0, 4 }
 0x219   : > { %v613_v48 = vpop.permute.xlu1 %612 }
 0x21a   : > { %v659_v51 = vsel %vm646_vm5, %v658_v47, %v613_v48  ;;  %v660_v52 = vrot.slane %v613_v48, 4 }
 0x21b   : > { %v665_v56 = vperm.slane %v659_v51, %v3016_v45 }
 0x21c   : > { %v661_v57 = vsel %vm646_vm5, %v619_v37, %v660_v52 }
 0x21d   : > { %v669_v61 = vperm.slane %v661_v57, %v3016_v45  ;;  %v694_v62 = vrot.slane %v665_v56, 4  ;;  %v697_v6 = vsel %vm646_vm5, %v665_v56, %v696_v63 }
 0x21e   : > { %v705_v15 = vperm.slane %v697_v6, %v3029_v2 }
 0x21f   : > { %v706_v3 = vrot.slane %v669_v61, 4  ;;  %v695_v5 = vsel %vm646_vm5, %v694_v62, %v653_v50  ;;  %v709_v18 = vsel %vm646_vm5, %v669_v61, %v708_v7 }
 0x220   : > { %v701_v14 = vperm.slane %v695_v5, %v3029_v2  ;;  %v717_v26 = vperm.slane %v709_v18, %v3029_v2  ;;  %v748_v28 = vrot.slane %v705_v15, 4 }
 0x221   : > { %v622_v9 = vpop.permute.xlu1 %621  ;;  %v707_v12 = vsel %vm646_vm5, %v706_v3, %v657_v58 }
 0x222   : > { %v671_v13 = vsel %vm646_vm5, %v670_v4, %v622_v9  ;;  %v672_v16 = vrot.slane %v622_v9, 4  ;;  %v713_v19 = vperm.slane %v707_v12, %v3029_v2  ;;  %v744_v27 = vrot.slane %v701_v14, 4 }
 0x223   : > { %v677_v17 = vperm.slane %v671_v13, %v3016_v45  ;;  %v756_v48 = vrot.slane %v717_v26, 4 }
 0x224   : > { %v673_v20 = vsel %vm646_vm5, %v628_v60, %v672_v16  ;;  %v752_v36 = vrot.slane %v713_v19, 4 }
 0x225   : > { %v719_v21 = vsel %vm646_vm5, %v718_v11, %v677_v17  ;;  %v720_v22 = vrot.slane %v677_v17, 4  ;;  %v681_v24 = vperm.slane %v673_v20, %v3016_v45 }
 0x226   : > { %v725_v25 = vperm.slane %v719_v21, %v3029_v2 }
 0x227   : > { %v721_v29 = vsel %vm646_vm5, %v689_v0, %v720_v22  ;;  %v731_v32 = vsel %vm646_vm5, %v730_v23, %v681_v24  ;;  %v732_v33 = vrot.slane %v681_v24, 4 }
 0x228   : > { %v729_v31 = vperm.slane %v721_v29, %v3029_v2  ;;  %v742_v35 = vrot.slane %v725_v25, 4  ;;  %v737_v37 = vperm.slane %v731_v32, %v3029_v2  ;;  %v745_v38 = vsel %vm646_vm5, %v725_v25, %v744_v27 }
 0x229   : > { %v733_v39 = vsel %vm646_vm5, %v693_v10, %v732_v33  ;;  %v828_v51 = vrot.slane %v745_v38, 4 }
 0x22a   : > { %v743_v40 = vsel %vm646_vm5, %v742_v35, %v701_v14  ;;  %v746_v41 = vrot.slane %v729_v31, 4  ;;  %v749_v42 = vsel %vm646_vm5, %v729_v31, %v748_v28  ;;  %v741_v43 = vperm.slane %v733_v39, %v3029_v2 }
 0x22b   : > { %v750_v44 = vrot.slane %v737_v37, 4  ;;  %v753_v46 = vsel %vm646_vm5, %v737_v37, %v752_v36  ;;  %v816_v47 = vrot.slane %v743_v40, 4  ;;  %v826_v50 = vrot.slane %v749_v42, 4 }
 0x22c   : > { %v747_v49 = vsel %vm646_vm5, %v746_v41, %v705_v15  ;;  %v754_v52 = vrot.slane %v741_v43, 4  ;;  %v852_v54 = vrot.slane %v753_v46, 4  ;;  %v757_v57 = vsel %vm646_vm5, %v741_v43, %v756_v48 }
 0x22d   : > { %v814_v53 = vrot.slane %v747_v49, 4  ;;  %v751_v55 = vsel %vm646_vm5, %v750_v44, %v713_v19  ;;  %v827_v56 = vsel %vm646_vm5, %v826_v50, %v745_v38  ;;  %v817_v58 = vsel %vm646_vm5, %v747_v49, %v816_v47 }
 0x22e   : > { %v829_v59 = vsel %vm646_vm5, %v749_v42, %v828_v51  ;;  %v833_v61 = vperm.slane %v827_v56, %v3016_v45  ;;  %v755_v62 = vsel %vm646_vm5, %v754_v52, %v717_v26  ;;  %v825_v63 = vperm.slane %v817_v58, %v3016_v45 }
 0x22f   : > { %v815_v60 = vsel %vm646_vm5, %v814_v53, %v743_v40  ;;  %v837_v0 = vperm.slane %v829_v59, %v3016_v45  ;;  %v838_v1 = vrot.slane %v755_v62, 4  ;;  %v840_v3 = vrot.slane %v751_v55, 4 }
 0x230   : > { %v850_v4 = vrot.slane %v757_v57, 4  ;;  %v853_v5 = vsel %vm646_vm5, %v757_v57, %v852_v54  ;;  %v876_v6 = vrot.slane %v825_v63, 4  ;;  %v821_v7 = vperm.slane %v815_v60, %v3016_v45 }
 0x231   : > { %v862_v9 = vrot.slane %v833_v61, 4  ;;  %v841_v10 = vsel %vm646_vm5, %v755_v62, %v840_v3  ;;  %v861_v11 = vperm.slane %v853_v5, %v3016_v45  ;;  %v874_v12 = vrot.slane %v837_v0, 4 }
 0x232   : > { %v839_v13 = vsel %vm646_vm5, %v838_v1, %v751_v55  ;;  %v849_v14 = vperm.slane %v841_v10, %v3016_v45  ;;  %v877_v15 = vsel %vm646_vm5, %v837_v0, %v876_v6  ;;  %v851_v17 = vsel %vm646_vm5, %v850_v4, %v753_v46 }
 0x233   : > { %v845_v16 = vperm.slane %v839_v13, %v3016_v45  ;;  %v875_v18 = vsel %vm646_vm5, %v874_v12, %v825_v63  ;;  %v898_v19 = vrot.slane %v861_v11, 4  ;;  %v885_v20 = vperm.slane %v877_v15, %v3029_v2 }
 0x234   : > { %v857_v21 = vperm.slane %v851_v17, %v3016_v45  ;;  %v881_v22 = vperm.slane %v875_v18, %v3029_v2  ;;  %v900_v23 = vrot.slane %v849_v14, 4  ;;  %v863_v24 = vsel %vm646_vm5, %v862_v9, %v821_v7 }
 0x235   : > { %v864_v25 = vrot.slane %v821_v7, 4  ;;  %v899_v26 = vsel %vm646_vm5, %v898_v19, %v849_v14  ;;  %v924_v27 = vrot.slane %v885_v20, 4  ;;  %v869_v28 = vperm.slane %v863_v24, %v3029_v2  ;;  %v2773_v7 = vld [vmem:[%s2963_s26] ss:$0 sm:$0xff] }
 0x236   : > { %v886_v29 = vrot.slane %v857_v21, 4  ;;  %v905_v31 = vperm.slane %v899_v26, %v3029_v2  ;;  %v920_v32 = vrot.slane %v881_v22, 4  ;;  %v901_v33 = vsel %vm646_vm5, %v861_v11, %v900_v23 }
 0x237   : > { %v888_v35 = vrot.slane %v845_v16, 4  ;;  %v909_v36 = vperm.slane %v901_v33, %v3029_v2  ;;  %v865_v38 = vsel %vm646_vm5, %v833_v61, %v864_v25  ;;  %v912_v50 = vrot.slane %v869_v28, 4 }
 0x238   : > { %v887_v37 = vsel %vm646_vm5, %v886_v29, %v845_v16  ;;  %v921_v39 = vsel %vm646_vm5, %v905_v31, %v920_v32  ;;  %v918_v40 = vrot.slane %v905_v31, 4  ;;  %v873_v42 = vperm.slane %v865_v38, %v3029_v2  ;;  %v640_v29 = vpop.permute.xlu1 %639 }
 0x239   : > { %v893_v41 = vperm.slane %v887_v37, %v3029_v2  ;;  %v985_v43 = vpack.c.bf16 %v921_v39, %v921_v39  ;;  %v925_v44 = vsel %vm646_vm5, %v909_v36, %v924_v27  ;;  %v922_v46 = vrot.slane %v909_v36, 4 }
 0x23a   : > { %v889_v47 = vsel %vm646_vm5, %v857_v21, %v888_v35  ;;  %v919_v48 = vsel %vm646_vm5, %v918_v40, %v881_v22  ;;  %v987_v49 = vpack.c.bf16 %v925_v44, %v925_v44  ;;  %v916_v59 = vrot.slane %v873_v42, 4 }
 0x23b   : > { %v1016_v51 = vsel %vm992_vm6, %v985_v43, 0  ;;  %v984_v52 = vpack.c.bf16 %v919_v48, %v919_v48  ;;  %v923_v53 = vsel %vm646_vm5, %v922_v46, %v885_v20  ;;  %v910_v56 = vrot.slane %v893_v41, 4 }
 0x23c   : > { %1025 = vmatpush.bf16.xpose.msra.mxu2 %v1016_v51  ;;  %v1054_v54 = vsel %vm992_vm6, %v987_v49, 0  ;;  %v986_v55 = vpack.c.bf16 %v923_v53, %v923_v53  ;;  %v897_v57 = vperm.slane %v889_v47, %v3029_v2  ;;  %v913_v61 = vsel %vm646_vm5, %v893_v41, %v912_v50 }
 0x23d   : > { %v997_v58 = vsel %vm992_vm6, %v984_v52, 0  ;;  %1063 = vmatpush.bf16.xpose.msrb.mxu0 %v1054_v54  ;;  %v911_v0 = vsel %vm646_vm5, %v910_v56, %v869_v28  ;;  %v981_v1 = vpack.c.bf16 %v913_v61, %v913_v61  ;;  %v758_v52 = vrot.slane %v640_v29, 4 }
 0x23e   : > { %1006 = vmatpush.bf16.xpose.msra.mxu1 %v997_v58  ;;  %v1035_v60 = vsel %vm992_vm6, %v986_v55, 0  ;;  %v914_v62 = vrot.slane %v897_v57, 4  ;;  %v917_v63 = vsel %vm646_vm5, %v897_v57, %v916_v59  ;;  %v980_v5 = vpack.c.bf16 %v911_v0, %v911_v0 }
 0x23f   : > { %1044 = vmatpush.bf16.xpose.msra.mxu3 %v1035_v60  ;;  %v983_v4 = vpack.c.bf16 %v917_v63, %v917_v63 }
 0x240   : > { %v915_v3 = vsel %vm646_vm5, %v914_v62, %v873_v42 }
 0x241   : > { %v982_v6 = vpack.c.bf16 %v915_v3, %v915_v3 }
 0x243   : > { %2619 = vmatmul.msk.bf16.vlgmr.msra.gmra.mxu2 %vm992_vm6, %v981_v1 }
 0x244   : > { %2621 = vmatmul.msk.bf16.vlgmr.msrb.gmra.mxu0 %vm992_vm6, %v983_v4 }
 0x245   : > { %2618 = vmatmul.msk.bf16.vlgmr.msra.gmra.mxu1 %vm992_vm6, %v980_v5 }
 0x246   : > { %2620 = vmatmul.msk.bf16.vlgmr.msra.gmra.mxu3 %vm992_vm6, %v982_v6 }
 0x2c1   : > { %v1065_v9 = vpop.f32.mrf.mxu0 }
 0x2c2   : > { %v1008_v10 = vpop.f32.mrf.mxu1  ;;  %v1072_v11 = vmul.f32 0.35355338, %v1065_v9 }
 0x2c3   : > { %v1069_v12 = vmul.f32 0.35355338, %v1008_v10 }
 0x2c4   : > { %v1079_v13 = vadd.f32 %v2773_v7, %v1072_v11 }
 0x2c5   : > { %v1076_v14 = vadd.f32 %v2773_v7, %v1069_v12 }
 0x2c6   : > { %v1027_v15 = vpop.f32.mrf.mxu2  ;;  %v1089_v16 = vsel %vm992_vm6, %v1079_v13, -inf }
 0x2c7   : > { %v1070_v17 = vmul.f32 0.35355338, %v1027_v15  ;;  %1090 = vmax.xlane.f32.xlu2 %v1089_v16  ;;  %v1080_v18 = vsel %vm992_vm6, %v1076_v14, -inf }
 0x2c8   : > { %1081 = vmax.xlane.f32.xlu0 %v1080_v18 }
 0x2c9   : > { %v1046_v19 = vpop.f32.mrf.mxu3  ;;  %v1067_v20 = vpop.f32.mrf.mxu0  ;;  %v1077_v21 = vadd.f32 %v2773_v7, %v1070_v17 }
 0x2ca   : > { %v1010_v22 = vpop.f32.mrf.mxu1  ;;  %v1071_v23 = vmul.f32 0.35355338, %v1046_v19 }
 0x2cb   : > { %v1083_v24 = vsel %vm992_vm6, %v1077_v21, -inf }
 0x2cc   : > { %1084 = vmax.xlane.f32.xlu1 %v1083_v24  ;;  %v1078_v25 = vadd.f32 %v2773_v7, %v1071_v23 }
 0x2ce   : > { %v1029_v26 = vpop.f32.mrf.mxu2  ;;  %v1086_v27 = vsel %vm992_vm6, %v1078_v25, -inf }
 0x2cf   : > { %1087 = vmax.xlane.f32.xlu2 %v1086_v27 }
 0x2d1   : > { %v1048_v28 = vpop.f32.mrf.mxu3 }
 0x2dc   : > { %642 = vrot.lane.b32.xlu0 %v2996_v34, %s3574_s27 }
 0x2e5   : > { %636 = vrot.lane.b32.xlu1 %v2996_v34, %s3575_s28  ;;  %s3581_s28 = smov 72  }
 0x2e7   : > { %633 = vrot.lane.b32.xlu2 %v2996_v34, %s3577_s29  ;;  %s3582_s29 = smov 64  }
 0x33a   : > { %v1091_v31 = vpop.xlane.xlu2 %1090 }
 0x33b   : > { %v1082_v32 = vpop.xlane.xlu0 %1081  ;;  %v1095_v38 = vsub.f32 %v1079_v13, %v1091_v31 }
 0x33c   : > { %v1092_v33 = vsub.f32 %v1076_v14, %v1082_v32 }
 0x33d   : > { %v1102_v44 = vmul.f32 1.442695, %v1095_v38 }
 0x33e   : > { %v1096_v35 = vmul.f32 1.442695, %v1092_v33 }
 0x33f   : > { %v1085_v36 = vpop.xlane.xlu1 %1084 }
 0x340   : > { %2796 = vpow2.f32 %v1096_v35  ;;  %v1093_v37 = vsub.f32 %v1077_v21, %v1085_v36 }
 0x342   : > { %v1098_v39 = vmul.f32 1.442695, %v1093_v37  ;;  %v1088_v40 = vpop.xlane.xlu2 %1087 }
 0x343   : > { %v1094_v41 = vsub.f32 %v1078_v25, %v1088_v40 }
 0x344   : > { %2798 = vpow2.f32 %v1098_v39 }
 0x345   : > { %v1100_v42 = vmul.f32 1.442695, %v1094_v41 }
 0x346   : > { %v3119_v43 = vpop.eup %2796 }
 0x347   : > { %2800 = vpow2.f32 %v1100_v42  ;;  %v1104_v34 = vsel %vm992_vm6, %v3119_v43, 0.0 }
 0x348   : > { %1105 = vadd.xlane.f32.xlu1 %v1104_v34  ;;  %2802 = vpow2.f32 %v1102_v44 }
 0x34a   : > { %v3123_v46 = vpop.eup %2798  ;;  %v634_v49 = vpop.permute.xlu2 %633 }
 0x34b   : > { %v1107_v47 = vsel %vm992_vm6, %v3123_v46, 0.0  ;;  %v760_v53 = vrot.slane %v634_v49, 4  ;;  %v759_v54 = vsel %vm646_vm5, %v758_v52, %v634_v49 }
 0x34c   : > { %1108 = vadd.xlane.f32.xlu2 %v1107_v47  ;;  %v765_v58 = vperm.slane %v759_v54, %v3016_v45 }
 0x34d   : > { %v3127_v48 = vpop.eup %2800  ;;  %v761_v57 = vsel %vm646_vm5, %v640_v29, %v760_v53 }
 0x34e   : > { %v1110_v50 = vsel %vm992_vm6, %v3127_v48, 0.0  ;;  %v3131_v51 = vpop.eup %2802  ;;  %v643_v55 = vpop.permute.xlu0 %642  ;;  %v769_v60 = vperm.slane %v761_v57, %v3016_v45  ;;  %v784_v0 = vrot.slane %v765_v58, 4 }
 0x34f   : > { %1111 = vadd.xlane.f32.xlu0 %v1110_v50  ;;  %v1113_v56 = vsel %vm992_vm6, %v3131_v51, 0.0  ;;  %v770_v59 = vrot.slane %v643_v55, 4 }
 0x350   : > { %v796_v4 = vrot.slane %v769_v60, 4 }
 0x354   : > { %1114 = vadd.xlane.f32.xlu2 %v1113_v56 }
 0x357   : > { %v637_v61 = vpop.permute.xlu1 %636 }
 0x358   : > { %v771_v62 = vsel %vm646_vm5, %v770_v59, %v637_v61  ;;  %v772_v63 = vrot.slane %v637_v61, 4 }
 0x359   : > { %v777_v1 = vperm.slane %v771_v62, %v3016_v45 }
 0x35a   : > { %v773_v3 = vsel %vm646_vm5, %v643_v55, %v772_v63 }
 0x35b   : > { %v781_v5 = vperm.slane %v773_v3, %v3016_v45  ;;  %v782_v6 = vrot.slane %v777_v1, 4  ;;  %v785_v7 = vsel %vm646_vm5, %v777_v1, %v784_v0 }
 0x35c   : > { %v793_v9 = vperm.slane %v785_v7, %v3029_v2 }
 0x35d   : > { %v783_v10 = vsel %vm646_vm5, %v782_v6, %v765_v58  ;;  %v794_v11 = vrot.slane %v781_v5, 4  ;;  %v797_v12 = vsel %vm646_vm5, %v781_v5, %v796_v4 }
 0x35e   : > { %v789_v13 = vperm.slane %v783_v10, %v3029_v2  ;;  %v805_v14 = vperm.slane %v797_v12, %v3029_v2  ;;  %v808_v15 = vrot.slane %v793_v9, 4 }
 0x35f   : > { %v795_v16 = vsel %vm646_vm5, %v794_v11, %v769_v60 }
 0x360   : > { %v801_v17 = vperm.slane %v795_v16, %v3029_v2  ;;  %v806_v18 = vrot.slane %v789_v13, 4  ;;  %v809_v19 = vsel %vm646_vm5, 0.0, %v808_v15  ;;  %v812_v20 = vrot.slane %v805_v14, 4 }
 0x361   : > { %v926_v21 = vsel %vm646_vm5, %v808_v15, %v789_v13  ;;  %v931_v22 = vrot.slane %v809_v19, 4 }
 0x362   : > { %v807_v23 = vsel %vm646_vm5, 0.0, %v806_v18  ;;  %v810_v24 = vrot.slane %v801_v17, 4  ;;  %v813_v25 = vsel %vm646_vm5, 0.0, %v812_v20  ;;  %v930_v26 = vperm.slane %v926_v21, %v3016_v45 }
 0x363   : > { %v932_v27 = vsel %vm646_vm5, %v931_v22, %v807_v23  ;;  %v937_v28 = vsel %vm646_vm5, %v812_v20, %v801_v17  ;;  %v942_v29 = vrot.slane %v813_v25, 4 }
 0x364   : > { %v811_v31 = vsel %vm646_vm5, 0.0, %v810_v24  ;;  %v936_v32 = vperm.slane %v932_v27, %v3016_v45  ;;  %v950_v33 = vrot.slane %v930_v26, 4  ;;  %v941_v35 = vperm.slane %v937_v28, %v3016_v45 }
 0x365   : > { %v943_v36 = vsel %vm646_vm5, %v942_v29, %v811_v31 }
 0x366   : > { %v947_v37 = vperm.slane %v943_v36, %v3016_v45  ;;  %v951_v38 = vsel %vm646_vm5, %v936_v32, %v950_v33  ;;  %v962_v39 = vrot.slane %v941_v35, 4  ;;  %v948_v40 = vrot.slane %v936_v32, 4 }
 0x367   : > { %v959_v41 = vperm.slane %v951_v38, %v3029_v2 }
 0x368   : > { %v963_v42 = vsel %vm646_vm5, %v947_v37, %v962_v39  ;;  %v949_v44 = vsel %vm646_vm5, %v948_v40, %v930_v26  ;;  %v960_v34 = vrot.slane %v947_v37, 4 }
 0x369   : > { %v971_v47 = vperm.slane %v963_v42, %v3029_v2  ;;  %v978_v49 = vrot.slane %v959_v41, 4  ;;  %v955_v50 = vperm.slane %v949_v44, %v3029_v2 }
 0x36a   : > { %v961_v52 = vsel %vm646_vm5, %v960_v34, %v941_v35 }
 0x36b   : > { %v979_v53 = vsel %vm646_vm5, %v971_v47, %v978_v49  ;;  %v967_v54 = vperm.slane %v961_v52, %v3029_v2  ;;  %v974_v55 = vrot.slane %v955_v50, 4  ;;  %v976_v56 = vrot.slane %v971_v47, 4 }
 0x36c   : > { %v991_v57 = vpack.c.bf16 %v979_v53, %v979_v53 }
 0x36d   : > { %v975_v58 = vsel %vm646_vm5, %v967_v54, %v974_v55  ;;  %v977_v59 = vsel %vm646_vm5, %v976_v56, %v959_v41  ;;  %v972_v60 = vrot.slane %v967_v54, 4 }
 0x36e   : > { %v1242_v61 = vsel %vm1183_vm7, %v991_v57, 0  ;;  %v989_v62 = vpack.c.bf16 %v975_v58, %v975_v58  ;;  %v990_v63 = vpack.c.bf16 %v977_v59, %v977_v59 }
 0x36f   : > { %1251 = vmatpush.bf16.msra.mxu0 %v1242_v61  ;;  %v973_v0 = vsel %vm646_vm5, %v972_v60, %v955_v50 }
 0x370   : > { %v1204_v1 = vsel %vm1183_vm7, %v989_v62, 0  ;;  %v1223_v3 = vsel %vm1183_vm7, %v990_v63, 0  ;;  %v988_v4 = vpack.c.bf16 %v973_v0, %v973_v0  ;;  %v1262_v0 = vld [vmem:[%s3561_s6 + $0x4] sm:$0xf] }
 0x371   : > { %1213 = vmatpush.bf16.msrb.mxu2 %v1204_v1  ;;  %1232 = vmatpush.bf16.msrb.mxu3 %v1223_v3  ;;  %v1288_v1 = vsel %vm1183_vm7, %v1262_v0, 0 }
 0x372   : > { %v1185_v5 = vsel %vm1183_vm7, %v988_v4, 0  ;;  %v1264_v4 = vld [vmem:[%s3561_s6 + $0xc] sm:$0xf] }
 0x373   : > { %1194 = vmatpush.bf16.msrb.mxu1 %v1185_v5  ;;  %v1326_v5 = vsel %vm1183_vm7, %v1264_v4, 0 }
 0x374   : > { %1335 = vmatpush.bf16.msrb.mxu0 %v1326_v5 }
 0x375   : > { %1297 = vmatpush.bf16.msra.mxu2 %v1288_v1 }
 0x3bb   : > { %v1106_v6 = vpop.xlane.xlu1 %1105 }
 0x3bc   : > { %2804 = vrcp.f32 %v1106_v6  ;;  %v1125_v14 = vand.u32 2147483647, %v1106_v6  ;;  %v1127_v15 = vand.u32 2147483648, %v1106_v6  ;;  %vm1121_vm9 = vweird.f32 %v1106_v6 }
 0x3be   : > { %vm1126_vm11 = vcmp.eq.f32.partialorder %v1125_v14, 8.507059e+37  ;;  %v1128_v22 = vor.u32 1.1754944e-38, %v1127_v15 }
 0x3bf   : > { %v1109_v7 = vpop.xlane.xlu2 %1108 }
 0x3c0   : > { %2806 = vrcp.f32 %v1109_v7  ;;  %v1142_v23 = vand.u32 2147483648, %v1109_v7  ;;  %v1140_v26 = vand.u32 2147483647, %v1109_v7  ;;  %vm1136_vm13 = vweird.f32 %v1109_v7 }
 0x3c2   : > { %v2805_v9 = vpop.eup %2804  ;;  %v1112_v10 = vpop.xlane.xlu0 %1111  ;;  %v1143_v36 = vor.u32 1.1754944e-38, %v1142_v23  ;;  %vm1141_vm1 = vcmp.eq.f32.partialorder %v1140_v26, 8.507059e+37 }
 0x3c3   : > { %v1117_v11 = vmul.f32 %v2805_v9, %v1106_v6  ;;  %2808 = vrcp.f32 %v1112_v10  ;;  %vm1122_vm8 = vweird.f32 %v2805_v9  ;;  %v1157_v32 = vand.u32 2147483648, %v1112_v10 }
 0x3c4   : > { %vm1123_vm10 = vmor %vm1121_vm9, %vm1122_vm8  ;;  %v1155_v38 = vand.u32 2147483647, %v1112_v10  ;;  %vm1151_vm2 = vweird.f32 %v1112_v10 }
 0x3c5   : > { %v1118_v12 = vsub.f32 1.0, %v1117_v11  ;;  %v1158_v34 = vor.u32 1.1754944e-38, %v1157_v32 }
 0x3c6   : > { %v2807_v13 = vpop.eup %2806  ;;  %vm1156_vm4 = vcmp.eq.f32.partialorder %v1155_v38, 8.507059e+37 }
 0x3c7   : > { %v1119_v16 = vmul.f32 %v2805_v9, %v1118_v12  ;;  %v1132_v17 = vmul.f32 %v2807_v13, %v1109_v7  ;;  %v1115_v18 = vpop.xlane.xlu2 %1114  ;;  %vm1137_vm12 = vweird.f32 %v2807_v13 }
 0x3c8   : > { %2810 = vrcp.f32 %v1115_v18  ;;  %vm1138_vm14 = vmor %vm1136_vm13, %vm1137_vm12  ;;  %v1170_v49 = vand.u32 2147483647, %v1115_v18  ;;  %v1172_v50 = vand.u32 2147483648, %v1115_v18  ;;  %vm1166_vm9 = vweird.f32 %v1115_v18 }
 0x3c9   : > { %v2809_v19 = vpop.eup %2808  ;;  %v1120_v20 = vadd.f32 %v2805_v9, %v1119_v16  ;;  %v1133_v21 = vsub.f32 1.0, %v1132_v17 }
 0x3ca   : > { %v1147_v24 = vmul.f32 %v2809_v19, %v1112_v10  ;;  %vm1152_vm15 = vweird.f32 %v2809_v19  ;;  %v1173_v58 = vor.u32 1.1754944e-38, %v1172_v50 }
 0x3cb   : > { %v1134_v25 = vmul.f32 %v2807_v13, %v1133_v21  ;;  %v1124_v27 = vsel %vm1123_vm10, %v2805_v9, %v1120_v20  ;;  %vm1153_vm3 = vmor %vm1151_vm2, %vm1152_vm15 }
 0x3cc   : > { %v1148_v28 = vsub.f32 1.0, %v1147_v24  ;;  %v1129_v29 = vsel %vm1126_vm11, %v1128_v22, %v1124_v27  ;;  %vm1171_vm11 = vcmp.eq.f32.partialorder %v1170_v49, 8.507059e+37 }
 0x3cd   : > { %v1135_v31 = vadd.f32 %v2807_v13, %v1134_v25  ;;  %v1130_v33 = vmul.f32 %v3119_v43, %v1129_v29 }
 0x3ce   : > { %v2811_v35 = vpop.eup %2810  ;;  %v1149_v37 = vmul.f32 %v2809_v19, %v1148_v28 }
 0x3cf   : > { %v1162_v39 = vmul.f32 %v2811_v35, %v1115_v18  ;;  %v1176_v40 = vpack.c.bf16 %v1130_v33, %v1130_v33  ;;  %v1139_v41 = vsel %vm1138_vm14, %v2807_v13, %v1135_v31  ;;  %vm1167_vm8 = vweird.f32 %v2811_v35  ;;  %v2777_v31 = vld [vmem:[%s3562_s7] ss:$0 sm:$0xff] }
 0x3d0   : > { %v1150_v42 = vadd.f32 %v2809_v19, %v1149_v37  ;;  %v1144_v44 = vsel %vm1141_vm1, %v1143_v36, %v1139_v41  ;;  %vm1168_vm10 = vmor %vm1166_vm9, %vm1167_vm8 }
 0x3d1   : > { %v1163_v47 = vsub.f32 1.0, %v1162_v39  ;;  %2622 = vmatmul.msk.bf16.vlgmr.msrb.gmra.mxu1 %vm992_vm6, %v1176_v40  ;;  %v1145_v43 = vmul.f32 %v3123_v46, %v1144_v44 }
 0x3d2   : > { %v1154_v52 = vsel %vm1153_vm3, %v2809_v19, %v1150_v42 }
 0x3d3   : > { %v1164_v53 = vmul.f32 %v2811_v35, %v1163_v47  ;;  %v1177_v54 = vpack.c.bf16 %v1145_v43, %v1145_v43  ;;  %v1159_v55 = vsel %vm1156_vm4, %v1158_v34, %v1154_v52  ;;  %v2738_v47 = vld [vmem:[%s3565_s10 + $0x8] sm:$0xff]  ;;  %vm1504_vm4 = vcmask 523264  }
 0x3d4   : > { %v1160_v56 = vmul.f32 %v3127_v48, %v1159_v55  ;;  %v1261_v48 = vld [vmem:[%s3561_s6] sm:$0xf] }
 0x3d5   : > { %v1165_v57 = vadd.f32 %v2811_v35, %v1164_v53  ;;  %2623 = vmatmul.msk.bf16.vlgmr.msrb.gmra.mxu2 %vm992_vm6, %v1177_v54  ;;  %v1269_v63 = vsel %vm1183_vm7, %v1261_v48, 0 }
 0x3d6   : > { %v1178_v59 = vpack.c.bf16 %v1160_v56, %v1160_v56  ;;  %1278 = vmatpush.bf16.msra.mxu1 %v1269_v63  ;;  %v2780_v63 = vld [vmem:[%s3566_s11] ss:$0 sm:$0xff] }
 0x3d7   : > { %v1169_v60 = vsel %vm1168_vm10, %v2811_v35, %v1165_v57 }
 0x3d8   : > { %v1174_v46 = vsel %vm1171_vm11, %v1173_v58, %v1169_v60  ;;  %2624 = vmatmul.msk.bf16.vlgmr.msrb.gmra.mxu3 %vm992_vm6, %v1178_v59  ;;  %v2778_v58 = vld [vmem:[%s3563_s8] ss:$0 sm:$0xff] }
 0x3d9   : > { %v1175_v61 = vmul.f32 %v3131_v51, %v1174_v46  ;;  %v1263_v51 = vld [vmem:[%s3561_s6 + $0x8] sm:$0xf]  ;;  %v2779_v60 = vld [vmem:[%s3564_s9] ss:$0 sm:$0xff] }
 0x3da   : > { %v1307_v3 = vsel %vm1183_vm7, %v1263_v51, 0  ;;  %1416 = vmatpush.bf16.msrb.mxu1 %v2738_v47 }
 0x3db   : > { %v1179_v62 = vpack.c.bf16 %v1175_v61, %v1175_v61  ;;  %1316 = vmatpush.bf16.msra.mxu3 %v1307_v3 }
 0x3dd   : > { %2625 = vmatmul.msk.bf16.vlgmr.msra.gmra.mxu0 %vm992_vm6, %v1179_v62 }
 0x44e   : > { %v1196_v6 = vpop.f32.mrf.mxu1 }
 0x44f   : > { %v1257_v7 = vpack.c.bf16 %v1196_v6, %v1196_v6 }
 0x451   : > { %2626 = vmatmul.msk.bf16.vlgmr.msra.gmra.mxu1 %vm992_vm6, %v1257_v7 }
 0x456   : > { %v1198_v9 = vpop.f32.mrf.mxu1 }
 0x458   : > { %v1215_v10 = vpop.f32.mrf.mxu2 }
 0x459   : > { %v1258_v11 = vpack.c.bf16 %v1215_v10, %v1215_v10 }
 0x45a   : > { %v1253_v12 = vpop.f32.mrf.mxu0 }
 0x45b   : > { %v1260_v13 = vpack.c.bf16 %v1253_v12, %v1253_v12  ;;  %2627 = vmatmul.msk.bf16.vlgmr.msra.gmra.mxu2 %vm992_vm6, %v1258_v11  ;;  %v1234_v14 = vpop.f32.mrf.mxu3  ;;  %v2742_v11 = vld [vmem:[%s3567_s12 + $0x18] sm:$0xff] }
 0x45c   : > { %v1259_v15 = vpack.c.bf16 %v1234_v14, %v1234_v14  ;;  %1512 = vmatpush.bf16.msrb.mxu2 %v2742_v11  ;;  %v2783_v11 = vld [vmem:[%s3570_s15] ss:$0 sm:$0xff] }
 0x45d   : > { %2629 = vmatmul.msk.bf16.vlgmr.msrb.gmra.mxu0 %vm992_vm6, %v1260_v13 }
 0x45e   : > { %2628 = vmatmul.msk.bf16.vlgmr.msra.gmra.mxu3 %vm992_vm6, %v1259_v15  ;;  %v2741_v15 = vld [vmem:[%s3567_s12 + $0x10] sm:$0xff] }
 0x460   : > { %v1217_v16 = vpop.f32.mrf.mxu2  ;;  %1513 = vmatpush.bf16.msrb.mxu2 %v2741_v15 }
 0x462   : > { %v1255_v17 = vpop.f32.mrf.mxu0 }
 0x463   : > { %v1236_v18 = vpop.f32.mrf.mxu3 }
 0x4ce   : > { %v1280_v19 = vpop.f32.mrf.mxu1 }
 0x4cf   : > { %v1341_v24 = vsel %vm536_vm0, %v1280_v19, 0.0  ;;  %v2740_v19 = vld [vmem:[%s3567_s12 + $0x8] sm:$0xff] }
 0x4d0   : > { %1514 = vmatpush.bf16.msrb.mxu2 %v2740_v19 }
 0x4d6   : > { %v1282_v20 = vpop.f32.mrf.mxu1 }
 0x4da   : > { %v1337_v21 = vpop.f32.mrf.mxu0 }
 0x4db   : > { %v1346_v32 = vsel %vm536_vm0, %v1337_v21, 0.0 }
 0x4de   : > { %v1299_v22 = vpop.f32.mrf.mxu2 }
 0x4df   : > { %v1342_v23 = vsel %vm536_vm0, %v1299_v22, 0.0  ;;  %v2739_v22 = vld [vmem:[%s3567_s12] sm:$0xff] }
 0x4e0   : > { %v1343_v25 = vadd.f32 %v1342_v23, %v1341_v24  ;;  %1515 = vmatpush.bf16.msrb.mxu2 %v2739_v22 }
 0x4e1   : > { %v1318_v26 = vpop.f32.mrf.mxu3 }
 0x4e2   : > { %v1344_v27 = vsel %vm536_vm0, %v1318_v26, 0.0  ;;  %v1339_v28 = vpop.f32.mrf.mxu0 }
 0x4e3   : > { %v1345_v29 = vadd.f32 %v1344_v27, %v1343_v25 }
 0x4e5   : > { %v1347_v33 = vadd.f32 %v1346_v32, %v1345_v29 }
 0x4e6   : > { %v1301_v35 = vpop.f32.mrf.mxu2 }
 0x4e7   : > { %v1352_v36 = vadd.f32 %v2777_v31, %v1347_v33 }
 0x4e9   : > { %v1320_v37 = vpop.f32.mrf.mxu3  ;;  %v1353_v38 = vadd.f32 %v1352_v36, %v2988_v30  ;;  %v2737_v30 = vld [vmem:[%s3565_s10] sm:$0xff] }
 0x4ea   : > { %1417 = vmatpush.bf16.msrb.mxu1 %v2737_v30 }
 0x4eb   : > { %v1356_v39 = vsel %vm536_vm0, %v1353_v38, 0.0 }
 0x4ec   : > { %1357 = vadd.xlane.f32.xlu0 %v1356_v39 }
 0x55f   : > { %v1358_v40 = vpop.xlane.xlu0 %1357 }
 0x560   : > { %v1359_v41 = vmul.f32 %v1358_v40, %v2971_v8 }
 0x562   : > { %v1360_v42 = vsub.f32 %v1353_v38, %v1359_v41 }
 0x564   : > { %v1361_v44 = vmul.f32 %v1360_v42, %v1360_v42 }
 0x566   : > { %v1362_v34 = vsel %vm536_vm0, %v1361_v44, 0.0 }
 0x567   : > { %1363 = vadd.xlane.f32.xlu1 %v1362_v34 }
 0x5da   : > { %v1364_v43 = vpop.xlane.xlu1 %1363 }
 0x5db   : > { %v1365_v49 = vmul.f32 %v1364_v43, %v2971_v8 }
 0x5dd   : > { %v1366_v50 = vadd.f32 1e-12, %v1365_v49 }
 0x5df   : > { %2812 = vrsqrt.f32 %v1366_v50  ;;  %vm1373_vm13 = vweird.f32 %v1366_v50 }
 0x5e5   : > { %v2813_v52 = vpop.eup %2812 }
 0x5e6   : > { %v1368_v53 = vmul.f32 %v2813_v52, %v1366_v50  ;;  %vm1374_vm12 = vweird.f32 %v2813_v52 }
 0x5e7   : > { %vm1375_vm14 = vmor %vm1373_vm13, %vm1374_vm12 }
 0x5e8   : > { %v1369_v54 = vmul.f32 %v2813_v52, %v1368_v53 }
 0x5ea   : > { %v1370_v55 = vmul.f32 0.5, %v1369_v54 }
 0x5ec   : > { %v1371_v56 = vsub.f32 1.5, %v1370_v55 }
 0x5ee   : > { %v1372_v57 = vmul.f32 %v2813_v52, %v1371_v56 }
 0x5f0   : > { %v1376_v59 = vsel %vm1375_vm14, %v2813_v52, %v1372_v57  ;;  %v2781_v52 = vld [vmem:[%s3568_s13] ss:$0 sm:$0xff] }
 0x5f1   : > { %v1377_v46 = vmul.f32 %v1376_v59, %v1360_v42 }
 0x5f3   : > { %v1381_v61 = vmul.f32 %v2778_v58, %v1377_v46 }
 0x5f5   : > { %v3231_v62 = vadd.f32 %v2779_v60, %v1381_v61 }
 0x5f7   : > { %v1386_v48 = vpack.c.bf16 %v3231_v62, %v3231_v62 }
 0x5f9   : > { %2638 = vmatmul.msk.bf16.vlgmr.msrb.gmra.mxu1 %vm536_vm0, %v1386_v48  ;;  %v2744_v48 = vld [vmem:[%s3559_s4 + $0x18] sm:$0xff] }
 0x5fa   : > { %1586 = vmatpush.bf16.msrb.mxu3 %v2744_v48 }
 0x676   : > { %v1419_v0 = vpop.f32.mrf.mxu1 }
 0x677   : > { %v1420_v1 = vadd.f32 %v2780_v63, %v1419_v0 }
 0x679   : > { %v1424_v51 = vmul.f32 0.70710677, %v1420_v1  ;;  %v1423_v30 = vmul.f32 0.5, %v1420_v1 }
 0x67b   : > { %v1425_v3 = vmul.f32 %v1424_v51, %v1424_v51 }
 0x67d   : > { %v1426_v4 = vmin.f32 %v1425_v3, 16.0 }
 0x67e   : > { %v1421_v5 = vpop.f32.mrf.mxu1 }
 0x67f   : > { %v1427_v6 = vmul.f32 2.1237322e-06, %v1426_v4  ;;  %v1438_v7 = vmul.f32 3.8918573e-05, %v1426_v4 }
 0x681   : > { %v1428_v9 = vadd.f32 0.00028619796, %v1427_v6  ;;  %v1439_v10 = vadd.f32 0.001143296, %v1438_v7 }
 0x683   : > { %v1429_v12 = vmul.f32 %v1428_v9, %v1426_v4  ;;  %v1440_v13 = vmul.f32 %v1439_v10, %v1426_v4  ;;  %v2782_v9 = vld [vmem:[%s3569_s14] ss:$0 sm:$0xff] }
 0x685   : > { %v1441_v14 = vadd.f32 0.014752088, %v1440_v13  ;;  %v1430_v16 = vadd.f32 0.0036580483, %v1429_v12 }
 0x687   : > { %v1442_v17 = vmul.f32 %v1441_v14, %v1426_v4  ;;  %v1431_v20 = vmul.f32 %v1430_v16, %v1426_v4  ;;  %v2784_v16 = vld [vmem:[%s3560_s5 + $0x1] ss:$0 sm:$0xff] }
 0x689   : > { %v1443_v18 = vadd.f32 0.112945676, %v1442_v17  ;;  %v1432_v24 = vadd.f32 0.05243302, %v1431_v20 }
 0x68b   : > { %v1444_v21 = vmul.f32 %v1443_v18, %v1426_v4  ;;  %v1433_v27 = vmul.f32 %v1432_v24, %v1426_v4 }
 0x68d   : > { %v1445_v23 = vadd.f32 0.4994258, %v1444_v21  ;;  %v1434_v28 = vadd.f32 0.18741608, %v1433_v27 }
 0x68f   : > { %v1446_v25 = vmul.f32 %v1445_v23, %v1426_v4  ;;  %v1435_v31 = vmul.f32 %v1434_v28, %v1426_v4 }
 0x691   : > { %v1447_v26 = vadd.f32 1.0, %v1446_v25  ;;  %v1436_v36 = vadd.f32 1.1283791, %v1435_v31 }
 0x693   : > { %2814 = vrcp.f32 %v1447_v26  ;;  %v1459_v35 = vand.u32 2147483648, %v1447_v26  ;;  %v1457_v38 = vand.u32 2147483647, %v1447_v26  ;;  %vm1453_vm1 = vweird.f32 %v1447_v26 }
 0x694   : > { %v1437_v41 = vmul.f32 %v1436_v36, %v1424_v51 }
 0x695   : > { %v1460_v40 = vor.u32 1.1754944e-38, %v1459_v35  ;;  %vm1458_vm3 = vcmp.eq.f32.partialorder %v1457_v38, 8.507059e+37 }
 0x699   : > { %v2815_v29 = vpop.eup %2814 }
 0x69a   : > { %v1449_v32 = vmul.f32 %v2815_v29, %v1447_v26  ;;  %vm1454_vm15 = vweird.f32 %v2815_v29 }
 0x69b   : > { %vm1455_vm2 = vmor %vm1453_vm1, %vm1454_vm15 }
 0x69c   : > { %v1450_v33 = vsub.f32 1.0, %v1449_v32 }
 0x69e   : > { %v1451_v37 = vmul.f32 %v2815_v29, %v1450_v33 }
 0x6a0   : > { %v1452_v39 = vadd.f32 %v2815_v29, %v1451_v37 }
 0x6a2   : > { %v1456_v42 = vsel %vm1455_vm2, %v2815_v29, %v1452_v39 }
 0x6a3   : > { %v1461_v44 = vsel %vm1458_vm3, %v1460_v40, %v1456_v42 }
 0x6a4   : > { %v1462_v34 = vmul.f32 %v1461_v44, %v1437_v41 }
 0x6a6   : > { %v2639_v47 = vclamps-f32 %v1462_v34, 1.0 }
 0x6a8   : > { %v1465_v43 = vadd.f32 1.0, %v2639_v47 }
 0x6aa   : > { %v1466_v49 = vmul.f32 %v1465_v43, %v1423_v30 }
 0x6ac   : > { %v1467_v50 = vpack.c.bf16 %v1466_v49, %v1466_v49 }
 0x6ae   : > { %2656 = vmatmul.msk.bf16.vlgmr.msrb.gmra.mxu2 %vm1504_vm4, %v1467_v50 }
 0x731   : > { %v1517_v53 = vpop.f32.mrf.mxu2 }
 0x732   : > { %v1518_v54 = vadd.f32 %v2781_v52, %v1517_v53 }
 0x734   : > { %v1521_v55 = vadd.f32 %v1518_v54, %v3231_v62  ;;  %v2743_v62 = vld [vmem:[%s3559_s4 + $0x10] sm:$0xff] }
 0x735   : > { %1587 = vmatpush.bf16.msrb.mxu3 %v2743_v62 }
 0x736   : > { %v1524_v56 = vsel %vm536_vm0, %v1521_v55, 0.0 }
 0x737   : > { %1525 = vadd.xlane.f32.xlu2 %v1524_v56 }
 0x739   : > { %v1519_v57 = vpop.f32.mrf.mxu2 }
 0x7aa   : > { %v1526_v58 = vpop.xlane.xlu2 %1525 }
 0x7ab   : > { %v1527_v59 = vmul.f32 %v1526_v58, %v2971_v8 }
 0x7ad   : > { %v1528_v60 = vsub.f32 %v1521_v55, %v1527_v59 }
 0x7af   : > { %v1529_v46 = vmul.f32 %v1528_v60, %v1528_v60 }
 0x7b1   : > { %v1530_v61 = vsel %vm536_vm0, %v1529_v46, 0.0 }
 0x7b2   : > { %1531 = vadd.xlane.f32.xlu0 %v1530_v61 }
 0x825   : > { %v1532_v63 = vpop.xlane.xlu0 %1531 }
 0x826   : > { %v1533_v0 = vmul.f32 %v1532_v63, %v2971_v8 }
 0x828   : > { %v1534_v1 = vadd.f32 1e-12, %v1533_v0 }
 0x82a   : > { %2816 = vrsqrt.f32 %v1534_v1  ;;  %vm1541_vm9 = vweird.f32 %v1534_v1 }
 0x830   : > { %v2817_v51 = vpop.eup %2816 }
 0x831   : > { %v1536_v3 = vmul.f32 %v2817_v51, %v1534_v1  ;;  %vm1542_vm8 = vweird.f32 %v2817_v51 }
 0x832   : > { %vm1543_vm10 = vmor %vm1541_vm9, %vm1542_vm8 }
 0x833   : > { %v1537_v4 = vmul.f32 %v2817_v51, %v1536_v3 }
 0x835   : > { %v1538_v5 = vmul.f32 0.5, %v1537_v4 }
 0x837   : > { %v1539_v6 = vsub.f32 1.5, %v1538_v5 }
 0x839   : > { %v1540_v7 = vmul.f32 %v2817_v51, %v1539_v6 }
 0x83b   : > { %v1544_v10 = vsel %vm1543_vm10, %v2817_v51, %v1540_v7 }
 0x83c   : > { %v1545_v12 = vmul.f32 %v1544_v10, %v1528_v60 }
 0x83e   : > { %v1549_v13 = vmul.f32 %v2782_v9, %v1545_v12 }
 0x840   : > { %v3272_v14 = vadd.f32 %v2783_v11, %v1549_v13 }
 0x842   : > { %v1554_v15 = vpack.c.bf16 %v3272_v14, %v3272_v14 }
 0x844   : > { %2670 = vmatmul.msk.bf16.vlgmr.msrb.gmra.mxu3 %vm536_vm0, %v1554_v15 }
 0x8c7   : > { %v1589_v17 = vpop.f32.mrf.mxu3 }
 0x8c8   : > { %v3280_v18 = vadd.f32 %v2784_v16, %v1589_v17 }
 0x8ca   : > { %1603 = vrot.lane.b32.xlu0 %v3280_v18, %s2856_s24  ;;  %1594 = vrot.lane.b32.xlu2 %v3280_v18, %s2854_s19  ;;  %s3583_s24 = smov 112   ;;  %v1629_v57 = vrot.slane %v3280_v18, 4 }
 0x8cb   : > { %1606 = vrot.lane.b32.xlu1 %v3280_v18, %s2853_s18  ;;  %s3586_s18 = smov 48  }
 0x8cf   : > { %v1591_v19 = vpop.f32.mrf.mxu3 }
 0x8d2   : > { %1600 = vrot.lane.b32.xlu0 %v3280_v18, %s2852_s17  ;;  %1609 = vrot.lane.b32.xlu2 %v3280_v18, %s2855_s20  ;;  %s3585_s17 = smov 40  }
 0x8d3   : > { %1612 = vrot.lane.b32.xlu1 %v3280_v18, %s3581_s28 }
 0x8da   : > { %1615 = vrot.lane.b32.xlu2 %v3280_v18, %s3582_s29  ;;  %s3587_s29 = sshll.u32 %s3589_s22, 3 }
 0x8db   : > { %1597 = vrot.lane.b32.xlu1 %v3280_v18, %s3583_s24 }
 0x924   : > { %v1595_v20 = vpop.permute.xlu2 %1594 }
 0x925   : > { %v1641_v33 = vrot.slane %v1595_v20, 4 }
 0x92c   : > { %v1610_v24 = vpop.permute.xlu2 %1609 }
 0x92d   : > { %v1651_v25 = vrot.slane %v1610_v24, 4 }
 0x93c   : > { %v1604_v21 = vpop.permute.xlu0 %1603 }
 0x93d   : > { %v1607_v22 = vpop.permute.xlu1 %1606  ;;  %v1653_v23 = vrot.slane %v1604_v21, 4  ;;  %v1652_v27 = vsel %vm646_vm5, %v1651_v25, %v1604_v21 }
 0x93e   : > { %v1665_v28 = vrot.slane %v1607_v22, 4  ;;  %v1658_v38 = vperm.slane %v1652_v27, %v3016_v45 }
 0x93f   : > { %v1654_v26 = vsel %vm646_vm5, %v1610_v24, %v1653_v23 }
 0x940   : > { %v1662_v31 = vperm.slane %v1654_v26, %v3016_v45  ;;  %v1701_v30 = vrot.slane %v1658_v38, 4 }
 0x942   : > { %v1713_v42 = vrot.slane %v1662_v31, 4 }
 0x944   : > { %v1601_v29 = vpop.permute.xlu0 %1600 }
 0x945   : > { %v1613_v32 = vpop.permute.xlu1 %1612  ;;  %v1639_v35 = vrot.slane %v1601_v29, 4  ;;  %v1642_v40 = vsel %vm646_vm5, %v1601_v29, %v1641_v33 }
 0x946   : > { %v1663_v36 = vrot.slane %v1613_v32, 4  ;;  %v1666_v37 = vsel %vm646_vm5, %v1613_v32, %v1665_v28  ;;  %v1650_v43 = vperm.slane %v1642_v40, %v3016_v45 }
 0x947   : > { %v1674_v39 = vperm.slane %v1666_v37, %v3016_v45  ;;  %v1640_v47 = vsel %vm646_vm5, %v1639_v35, %v1595_v20 }
 0x948   : > { %v1664_v41 = vsel %vm646_vm5, %v1663_v36, %v1607_v22  ;;  %v1646_v53 = vperm.slane %v1640_v47, %v3016_v45  ;;  %v1687_v60 = vrot.slane %v1650_v43, 4 }
 0x949   : > { %v1670_v44 = vperm.slane %v1664_v41, %v3016_v45  ;;  %v1711_v34 = vrot.slane %v1674_v39, 4  ;;  %v1714_v50 = vsel %vm646_vm5, %v1674_v39, %v1713_v42 }
 0x94a   : > { %v1722_v58 = vperm.slane %v1714_v50, %v3029_v2  ;;  %v1675_v1 = vrot.slane %v1646_v53, 4 }
 0x94b   : > { %v1699_v49 = vrot.slane %v1670_v44, 4  ;;  %v1712_v52 = vsel %vm646_vm5, %v1711_v34, %v1662_v31  ;;  %v1702_v55 = vsel %vm646_vm5, %v1670_v44, %v1701_v30 }
 0x94c   : > { %v1718_v46 = vperm.slane %v1712_v52, %v3029_v2  ;;  %v1710_v62 = vperm.slane %v1702_v55, %v3029_v2  ;;  %v1735_v3 = vrot.slane %v1722_v58, 4 }
 0x94d   : > { %v1700_v54 = vsel %vm646_vm5, %v1699_v49, %v1658_v38  ;;  %v1598_v56 = vpop.permute.xlu1 %1597 }
 0x94e   : > { %v1627_v59 = vrot.slane %v1598_v56, 4  ;;  %v1630_v61 = vsel %vm646_vm5, %v1598_v56, %v1629_v57  ;;  %v1706_v48 = vperm.slane %v1700_v54, %v3029_v2  ;;  %v1731_v6 = vrot.slane %v1718_v46, 4 }
 0x94f   : > { %v1638_v0 = vperm.slane %v1630_v61, %v3016_v45  ;;  %v1727_v12 = vrot.slane %v1710_v62, 4 }
 0x950   : > { %v1628_v63 = vsel %vm646_vm5, %v1627_v59, %v3280_v18  ;;  %v1723_v11 = vrot.slane %v1706_v48, 4 }
 0x951   : > { %v1634_v51 = vperm.slane %v1628_v63, %v3016_v45  ;;  %v1688_v4 = vsel %vm646_vm5, %v1687_v60, %v1638_v0  ;;  %v1689_v5 = vrot.slane %v1638_v0, 4 }
 0x952   : > { %v1694_v10 = vperm.slane %v1688_v4, %v3029_v2 }
 0x953   : > { %v1676_v7 = vsel %vm646_vm5, %v1675_v1, %v1634_v51  ;;  %v1677_v9 = vrot.slane %v1634_v51, 4  ;;  %v1690_v15 = vsel %vm646_vm5, %v1650_v43, %v1689_v5 }
 0x954   : > { %v1682_v13 = vperm.slane %v1676_v7, %v3029_v2  ;;  %v1698_v17 = vperm.slane %v1690_v15, %v3029_v2  ;;  %v1732_v19 = vsel %vm646_vm5, %v1731_v6, %v1694_v10  ;;  %v1733_v20 = vrot.slane %v1694_v10, 4 }
 0x955   : > { %v1678_v16 = vsel %vm646_vm5, %v1646_v53, %v1677_v9  ;;  %v1821_v24 = vrot.slane %v1732_v19, 4 }
 0x956   : > { %v1686_v21 = vperm.slane %v1678_v16, %v3029_v2  ;;  %v1724_v22 = vsel %vm646_vm5, %v1723_v11, %v1682_v13  ;;  %v1725_v23 = vrot.slane %v1682_v13, 4  ;;  %v1734_v25 = vsel %vm646_vm5, %v1718_v46, %v1733_v20 }
 0x957   : > { %v1736_v26 = vsel %vm646_vm5, %v1735_v3, %v1698_v17  ;;  %v1737_v27 = vrot.slane %v1698_v17, 4  ;;  %v1797_v28 = vrot.slane %v1724_v22, 4  ;;  %v1833_v42 = vrot.slane %v1734_v25, 4 }
 0x958   : > { %v1726_v29 = vsel %vm646_vm5, %v1706_v48, %v1725_v23  ;;  %v1728_v31 = vsel %vm646_vm5, %v1727_v12, %v1686_v21  ;;  %v1729_v32 = vrot.slane %v1686_v21, 4  ;;  %v1819_v33 = vrot.slane %v1736_v26, 4 }
 0x959   : > { %v1738_v35 = vsel %vm646_vm5, %v1722_v58, %v1737_v27  ;;  %v1795_v36 = vrot.slane %v1728_v31, 4  ;;  %v1809_v37 = vrot.slane %v1726_v29, 4  ;;  %v1822_v38 = vsel %vm646_vm5, %v1736_v26, %v1821_v24 }
 0x95a   : > { %v1820_v39 = vsel %vm646_vm5, %v1819_v33, %v1732_v19  ;;  %v1830_v40 = vperm.slane %v1822_v38, %v3016_v45  ;;  %v1831_v41 = vrot.slane %v1738_v35, 4  ;;  %v1730_v47 = vsel %vm646_vm5, %v1710_v62, %v1729_v32 }
 0x95b   : > { %v1796_v44 = vsel %vm646_vm5, %v1795_v36, %v1724_v22  ;;  %v1826_v34 = vperm.slane %v1820_v39, %v3016_v45  ;;  %v1798_v30 = vsel %vm646_vm5, %v1728_v31, %v1797_v28  ;;  %v1807_v52 = vrot.slane %v1730_v47, 4 }
 0x95c   : > { %v1802_v43 = vperm.slane %v1796_v44, %v3016_v45  ;;  %v1832_v49 = vsel %vm646_vm5, %v1831_v41, %v1734_v25  ;;  %v1806_v50 = vperm.slane %v1798_v30, %v3016_v45  ;;  %v1810_v55 = vsel %vm646_vm5, %v1730_v47, %v1809_v37 }
 0x95d   : > { %v1838_v53 = vperm.slane %v1832_v49, %v3016_v45  ;;  %v1869_v54 = vrot.slane %v1826_v34, 4  ;;  %v1834_v56 = vsel %vm646_vm5, %v1738_v35, %v1833_v42  ;;  %v1818_v57 = vperm.slane %v1810_v55, %v3016_v45 }
 0x95e   : > { %v1842_v58 = vperm.slane %v1834_v56, %v3016_v45  ;;  %v1857_v59 = vrot.slane %v1806_v50, 4  ;;  %v1881_v60 = vrot.slane %v1830_v40, 4  ;;  %v1808_v61 = vsel %vm646_vm5, %v1807_v52, %v1726_v29 }
 0x95f   : > { %v1867_v46 = vrot.slane %v1838_v53, 4  ;;  %v1845_v48 = vrot.slane %v1802_v43, 4  ;;  %v1870_v62 = vsel %vm646_vm5, %v1838_v53, %v1869_v54  ;;  %v1855_v1 = vrot.slane %v1818_v57, 4 }
 0x960   : > { %v1858_v63 = vsel %vm646_vm5, %v1818_v57, %v1857_v59  ;;  %v1882_v0 = vsel %vm646_vm5, %v1842_v58, %v1881_v60  ;;  %v1879_v51 = vrot.slane %v1842_v58, 4  ;;  %v1814_v5 = vperm.slane %v1808_v61, %v3016_v45  ;;  %v2840_v57 = vld [vmem:[%s2963_s26] ss:$0 sm:$0xff]  ;;  %s3584_s26 = smov 56  }
 0x961   : > { %v1866_v3 = vperm.slane %v1858_v63, %v3029_v2  ;;  %v1890_v4 = vperm.slane %v1882_v0, %v3029_v2  ;;  %v1856_v6 = vsel %vm646_vm5, %v1855_v1, %v1806_v50  ;;  %v1878_v9 = vperm.slane %v1870_v62, %v3029_v2 }
 0x962   : > { %v1880_v7 = vsel %vm646_vm5, %v1879_v51, %v1830_v40  ;;  %v1868_v10 = vsel %vm646_vm5, %v1867_v46, %v1826_v34  ;;  %v1862_v12 = vperm.slane %v1856_v6, %v3029_v2  ;;  %v1846_v16 = vsel %vm646_vm5, %v1814_v5, %v1845_v48 }
 0x963   : > { %v1903_v11 = vrot.slane %v1890_v4, 4  ;;  %v1886_v13 = vperm.slane %v1880_v7, %v3029_v2  ;;  %v1905_v15 = vrot.slane %v1866_v3, 4  ;;  %v1843_v17 = vrot.slane %v1814_v5, 4 }
 0x964   : > { %v1874_v19 = vperm.slane %v1868_v10, %v3029_v2  ;;  %v1901_v23 = vrot.slane %v1862_v12, 4  ;;  %v1854_v26 = vperm.slane %v1846_v16, %v3029_v2  ;;  %v1895_v31 = vrot.slane %v1878_v9, 4 }
 0x965   : > { %v1904_v20 = vsel %vm646_vm5, %v1903_v11, %v1866_v3  ;;  %v1899_v21 = vrot.slane %v1886_v13, 4  ;;  %v1906_v22 = vsel %vm646_vm5, %v1890_v4, %v1905_v15  ;;  %v1844_v27 = vsel %vm646_vm5, %v1843_v17, %v1802_v43 }
 0x966   : > { %v1967_v24 = vpack.c.bf16 %v1904_v20, %v1904_v20  ;;  %v1968_v25 = vpack.c.bf16 %v1906_v22, %v1906_v22  ;;  %v1902_v29 = vsel %vm646_vm5, %v1886_v13, %v1901_v23  ;;  %v1850_v32 = vperm.slane %v1844_v27, %v3029_v2 }
 0x967   : > { %v1900_v28 = vsel %vm646_vm5, %v1899_v21, %v1862_v12  ;;  %v1966_v37 = vpack.c.bf16 %v1902_v29, %v1902_v29  ;;  %v1891_v38 = vrot.slane %v1874_v19, 4  ;;  %v1897_v39 = vrot.slane %v1854_v26, 4 }
 0x968   : > { %v2015_v33 = vsel %vm992_vm6, %v1967_v24, 0  ;;  %v1965_v35 = vpack.c.bf16 %v1900_v28, %v1900_v28  ;;  %v2034_v36 = vsel %vm992_vm6, %v1968_v25, 0  ;;  %v1893_v40 = vrot.slane %v1850_v32, 4 }
 0x969   : > { %2024 = vmatpush.bf16.xpose.msra.mxu2 %v2015_v33  ;;  %2043 = vmatpush.bf16.xpose.msra.mxu3 %v2034_v36  ;;  %v1996_v42 = vsel %vm992_vm6, %v1966_v37, 0  ;;  %v1896_v44 = vsel %vm646_vm5, %v1895_v31, %v1854_v26  ;;  %v1898_v34 = vsel %vm646_vm5, %v1878_v9, %v1897_v39  ;;  %v1892_v47 = vsel %vm646_vm5, %v1891_v38, %v1850_v32  ;;  %v1616_v9 = vpop.permute.xlu2 %1615 }
 0x96a   : > { %v1977_v41 = vsel %vm992_vm6, %v1965_v35, 0  ;;  %2005 = vmatpush.bf16.xpose.msra.mxu1 %v1996_v42  ;;  %v1894_v30 = vsel %vm646_vm5, %v1874_v19, %v1893_v40  ;;  %v1963_v43 = vpack.c.bf16 %v1896_v44, %v1896_v44  ;;  %v1964_v49 = vpack.c.bf16 %v1898_v34, %v1898_v34 }
 0x96b   : > { %1986 = vmatpush.bf16.xpose.msra.mxu0 %v1977_v41  ;;  %v1961_v50 = vpack.c.bf16 %v1892_v47, %v1892_v47  ;;  %v1962_v52 = vpack.c.bf16 %v1894_v30, %v1894_v30  ;;  %v1741_v37 = vrot.slane %v1616_v9, 4 }
 0x970   : > { %2673 = vmatmul.msk.bf16.vlgmr.msra.gmra.mxu2 %vm992_vm6, %v1963_v43  ;;  %2674 = vmatmul.msk.bf16.vlgmr.msra.gmra.mxu3 %vm992_vm6, %v1964_v49 }
 0x971   : > { %2672 = vmatmul.msk.bf16.vlgmr.msra.gmra.mxu1 %vm992_vm6, %v1962_v52 }
 0x972   : > { %2671 = vmatmul.msk.bf16.vlgmr.msra.gmra.mxu0 %vm992_vm6, %v1961_v50 }
 0x9ee   : > { %v2007_v54 = vpop.f32.mrf.mxu1 }
 0x9ef   : > { %v1988_v53 = vpop.f32.mrf.mxu0  ;;  %v2050_v56 = vmul.f32 0.35355338, %v2007_v54 }
 0x9f0   : > { %v2049_v55 = vmul.f32 0.35355338, %v1988_v53 }
 0x9f1   : > { %v2054_v59 = vadd.f32 %v2840_v57, %v2050_v56 }
 0x9f2   : > { %v2053_v58 = vadd.f32 %v2840_v57, %v2049_v55 }
 0x9f3   : > { %v2026_v60 = vpop.f32.mrf.mxu2  ;;  %v2045_v46 = vpop.f32.mrf.mxu3  ;;  %v2060_v63 = vsel %vm992_vm6, %v2054_v59, -inf }
 0x9f4   : > { %v2051_v61 = vmul.f32 0.35355338, %v2026_v60  ;;  %v2052_v48 = vmul.f32 0.35355338, %v2045_v46  ;;  %v2057_v62 = vsel %vm992_vm6, %v2053_v58, -inf  ;;  %2061 = vmax.xlane.f32.xlu0 %v2060_v63 }
 0x9f5   : > { %2058 = vmax.xlane.f32.xlu1 %v2057_v62 }
 0x9f6   : > { %v2056_v0 = vadd.f32 %v2840_v57, %v2052_v48  ;;  %v2009_v51 = vpop.f32.mrf.mxu1  ;;  %v2055_v4 = vadd.f32 %v2840_v57, %v2051_v61 }
 0x9f7   : > { %v1990_v1 = vpop.f32.mrf.mxu0 }
 0x9f8   : > { %v2066_v3 = vsel %vm992_vm6, %v2056_v0, -inf  ;;  %v2063_v7 = vsel %vm992_vm6, %v2055_v4, -inf }
 0x9f9   : > { %2067 = vmax.xlane.f32.xlu2 %v2066_v3 }
 0x9fb   : > { %v2028_v5 = vpop.f32.mrf.mxu2  ;;  %v2047_v6 = vpop.f32.mrf.mxu3 }
 0x9fc   : > { %2064 = vmax.xlane.f32.xlu0 %v2063_v7 }
 0xa0e   : > { %1618 = vrot.lane.b32.xlu1 %v3280_v18, %s3584_s26 }
 0xa10   : > { %1621 = vrot.lane.b32.xlu0 %v3280_v18, %s3586_s18 }
 0xa11   : > { %1624 = vrot.lane.b32.xlu2 %v3280_v18, %s3585_s17  ;;  %s530_s17 = scalar_lea.vmem %s3571_s16, %s3587_s29 }
 0xa67   : > { %v2062_v11 = vpop.xlane.xlu0 %2061 }
 0xa68   : > { %v2059_v10 = vpop.xlane.xlu1 %2058  ;;  %v2070_v22 = vsub.f32 %v2054_v59, %v2062_v11 }
 0xa69   : > { %v2069_v12 = vsub.f32 %v2053_v58, %v2059_v10 }
 0xa6a   : > { %v2075_v25 = vmul.f32 1.442695, %v2070_v22 }
 0xa6b   : > { %v2073_v13 = vmul.f32 1.442695, %v2069_v12 }
 0xa6c   : > { %v2068_v15 = vpop.xlane.xlu2 %2067 }
 0xa6d   : > { %2818 = vpow2.f32 %v2073_v13  ;;  %v2072_v16 = vsub.f32 %v2056_v0, %v2068_v15 }
 0xa6f   : > { %v2079_v17 = vmul.f32 1.442695, %v2072_v16  ;;  %v2065_v19 = vpop.xlane.xlu0 %2064 }
 0xa70   : > { %v2071_v20 = vsub.f32 %v2055_v4, %v2065_v19 }
 0xa71   : > { %2820 = vpow2.f32 %v2079_v17 }
 0xa72   : > { %v2077_v23 = vmul.f32 1.442695, %v2071_v20 }
 0xa73   : > { %v3399_v21 = vpop.eup %2818 }
 0xa74   : > { %v2081_v24 = vsel %vm992_vm6, %v3399_v21, 0.0  ;;  %2822 = vpow2.f32 %v2077_v23  ;;  %v1625_v28 = vpop.permute.xlu2 %1624 }
 0xa75   : > { %2082 = vadd.xlane.f32.xlu2 %v2081_v24  ;;  %2824 = vpow2.f32 %v2075_v25  ;;  %v1751_v31 = vrot.slane %v1625_v28, 4 }
 0xa77   : > { %v3403_v18 = vpop.eup %2820 }
 0xa78   : > { %v2090_v26 = vsel %vm992_vm6, %v3403_v18, 0.0 }
 0xa79   : > { %2091 = vadd.xlane.f32.xlu1 %v2090_v26 }
 0xa7a   : > { %v3407_v27 = vpop.eup %2822 }
 0xa7b   : > { %v2087_v29 = vsel %vm992_vm6, %v3407_v27, 0.0  ;;  %v3411_v33 = vpop.eup %2824 }
 0xa7c   : > { %2088 = vadd.xlane.f32.xlu0 %v2087_v29  ;;  %v2084_v34 = vsel %vm992_vm6, %v3411_v33, 0.0 }
 0xa80   : > { %v1619_v32 = vpop.permute.xlu1 %1618 }
 0xa81   : > { %v1752_v35 = vsel %vm646_vm5, %v1751_v31, %v1619_v32  ;;  %v1753_v36 = vrot.slane %v1619_v32, 4 }
 0xa82   : > { %v1758_v39 = vperm.slane %v1752_v35, %v3016_v45  ;;  %v1622_v40 = vpop.permute.xlu0 %1621 }
 0xa83   : > { %v1754_v38 = vsel %vm646_vm5, %v1625_v28, %v1753_v36  ;;  %v1739_v42 = vrot.slane %v1622_v40, 4  ;;  %v1742_v44 = vsel %vm646_vm5, %v1622_v40, %v1741_v37 }
 0xa84   : > { %v1762_v41 = vperm.slane %v1754_v38, %v3016_v45  ;;  %v1750_v47 = vperm.slane %v1742_v44, %v3016_v45  ;;  %2085 = vadd.xlane.f32.xlu0 %v2084_v34  ;;  %v1763_v49 = vrot.slane %v1758_v39, 4 }
 0xa85   : > { %v1740_v43 = vsel %vm646_vm5, %v1739_v42, %v1616_v9 }
 0xa86   : > { %v1775_v30 = vrot.slane %v1762_v41, 4  ;;  %v1746_v50 = vperm.slane %v1740_v43, %v3016_v45  ;;  %v1777_v52 = vrot.slane %v1750_v47, 4 }
 0xa88   : > { %v1776_v53 = vsel %vm646_vm5, %v1775_v30, %v1750_v47  ;;  %v1764_v54 = vsel %vm646_vm5, %v1763_v49, %v1746_v50  ;;  %v1765_v55 = vrot.slane %v1746_v50, 4  ;;  %v1778_v56 = vsel %vm646_vm5, %v1762_v41, %v1777_v52 }
 0xa89   : > { %v1782_v57 = vperm.slane %v1776_v53, %v3029_v2  ;;  %v1770_v58 = vperm.slane %v1764_v54, %v3029_v2  ;;  %v1786_v59 = vperm.slane %v1778_v56, %v3029_v2 }
 0xa8a   : > { %v1766_v60 = vsel %vm646_vm5, %v1758_v39, %v1765_v55 }
 0xa8b   : > { %v1774_v46 = vperm.slane %v1766_v60, %v3029_v2  ;;  %v1791_v61 = vrot.slane %v1782_v57, 4  ;;  %v1793_v48 = vrot.slane %v1786_v59, 4  ;;  %v1787_v62 = vrot.slane %v1770_v58, 4 }
 0xa8d   : > { %v1789_v63 = vrot.slane %v1774_v46, 4  ;;  %v1794_v0 = vsel %vm646_vm5, 0.0, %v1793_v48  ;;  %v1918_v1 = vsel %vm646_vm5, %v1793_v48, %v1782_v57  ;;  %v1792_v5 = vsel %vm646_vm5, 0.0, %v1791_v61 }
 0xa8e   : > { %v1922_v51 = vperm.slane %v1918_v1, %v3016_v45  ;;  %v1923_v3 = vrot.slane %v1794_v0, 4  ;;  %v1788_v12 = vsel %vm646_vm5, 0.0, %v1787_v62 }
 0xa8f   : > { %v1790_v4 = vsel %vm646_vm5, 0.0, %v1789_v63  ;;  %v1907_v6 = vsel %vm646_vm5, %v1789_v63, %v1770_v58 }
 0xa90   : > { %v1912_v7 = vrot.slane %v1790_v4, 4  ;;  %v1924_v9 = vsel %vm646_vm5, %v1923_v3, %v1792_v5  ;;  %v1943_v10 = vrot.slane %v1922_v51, 4  ;;  %v1911_v11 = vperm.slane %v1907_v6, %v3016_v45 }
 0xa91   : > { %v1928_v13 = vperm.slane %v1924_v9, %v3016_v45 }
 0xa92   : > { %v1913_v15 = vsel %vm646_vm5, %v1912_v7, %v1788_v12  ;;  %v1931_v16 = vrot.slane %v1911_v11, 4 }
 0xa93   : > { %v1941_v17 = vrot.slane %v1928_v13, 4  ;;  %v1917_v19 = vperm.slane %v1913_v15, %v3016_v45  ;;  %v1944_v20 = vsel %vm646_vm5, %v1928_v13, %v1943_v10 }
 0xa94   : > { %v1952_v22 = vperm.slane %v1944_v20, %v3029_v2 }
 0xa95   : > { %v1932_v23 = vsel %vm646_vm5, %v1917_v19, %v1931_v16  ;;  %v1929_v24 = vrot.slane %v1917_v19, 4  ;;  %v1942_v25 = vsel %vm646_vm5, %v1941_v17, %v1922_v51 }
 0xa96   : > { %v1940_v26 = vperm.slane %v1932_v23, %v3029_v2  ;;  %v1957_v28 = vrot.slane %v1952_v22, 4  ;;  %v1948_v29 = vperm.slane %v1942_v25, %v3029_v2 }
 0xa97   : > { %v1930_v31 = vsel %vm646_vm5, %v1929_v24, %v1911_v11 }
 0xa98   : > { %v1958_v32 = vsel %vm646_vm5, %v1957_v28, %v1940_v26  ;;  %v1936_v45 = vperm.slane %v1930_v31, %v3029_v2  ;;  %v1953_v35 = vrot.slane %v1948_v29, 4  ;;  %v1959_v36 = vrot.slane %v1940_v26, 4 }
 0xa99   : > { %v1971_v37 = vpack.c.bf16 %v1958_v32, %v1958_v32 }
 0xa9a   : > { %v1954_v38 = vsel %vm646_vm5, %v1953_v35, %v1936_v45  ;;  %v1960_v39 = vsel %vm646_vm5, %v1952_v22, %v1959_v36  ;;  %v1955_v40 = vrot.slane %v1936_v45, 4 }
 0xa9b   : > { %v2199_v41 = vsel %vm1183_vm7, %v1971_v37, 0  ;;  %v1969_v42 = vpack.c.bf16 %v1954_v38, %v1954_v38  ;;  %v1972_v44 = vpack.c.bf16 %v1960_v39, %v1960_v39 }
 0xa9c   : > { %2208 = vmatpush.bf16.msrb.mxu2 %v2199_v41  ;;  %v1956_v34 = vsel %vm646_vm5, %v1948_v29, %v1955_v40  ;;  %v2679_v40 = vld [vmem:[%s3561_s6 + $0x10] sm:$0xf] }
 0xa9d   : > { %v2161_v47 = vsel %vm1183_vm7, %v1969_v42, 0  ;;  %v2218_v30 = vsel %vm1183_vm7, %v1972_v44, 0  ;;  %v1970_v2 = vpack.c.bf16 %v1956_v34, %v1956_v34  ;;  %v2246_v41 = vsel %vm1183_vm7, %v2679_v40, 0  ;;  %v2681_v42 = vld [vmem:[%s3561_s6 + $0x18] sm:$0xf] }
 0xa9e   : > { %2170 = vmatpush.bf16.msrb.mxu0 %v2161_v47  ;;  %2227 = vmatpush.bf16.msrb.mxu3 %v2218_v30  ;;  %v2682_v44 = vld [vmem:[%s3561_s6 + $0x1c] sm:$0xf]  ;;  %v2680_v47 = vld [vmem:[%s3561_s6 + $0x14] sm:$0xf] }
 0xa9f   : > { %v2180_v43 = vsel %vm1183_vm7, %v1970_v2, 0  ;;  %v2303_v34 = vsel %vm1183_vm7, %v2682_v44, 0  ;;  %v2265_v30 = vsel %vm1183_vm7, %v2680_v47, 0 }
 0xaa0   : > { %2189 = vmatpush.bf16.msrb.mxu1 %v2180_v43 }
 0xaa2   : > { %2255 = vmatpush.bf16.msra.mxu0 %v2246_v41  ;;  %2312 = vmatpush.bf16.msra.mxu3 %v2303_v34 }
 0xaa4   : > { %2274 = vmatpush.bf16.msra.mxu1 %v2265_v30 }
 0xae8   : > { %v2083_v49 = vpop.xlane.xlu2 %2082 }
 0xae9   : > { %2826 = vrcp.f32 %v2083_v49  ;;  %v2102_v57 = vand.u32 2147483647, %v2083_v49  ;;  %v2104_v58 = vand.u32 2147483648, %v2083_v49  ;;  %vm2098_vm11 = vweird.f32 %v2083_v49 }
 0xaeb   : > { %vm2103_vm13 = vcmp.eq.f32.partialorder %v2102_v57, 8.507059e+37  ;;  %v2105_v62 = vor.u32 1.1754944e-38, %v2104_v58 }
 0xaec   : > { %v2092_v50 = vpop.xlane.xlu1 %2091 }
 0xaed   : > { %2828 = vrcp.f32 %v2092_v50  ;;  %v2147_v63 = vand.u32 2147483647, %v2092_v50  ;;  %v2149_v0 = vand.u32 2147483648, %v2092_v50  ;;  %vm2143_vm15 = vweird.f32 %v2092_v50 }
 0xaef   : > { %v2827_v52 = vpop.eup %2826  ;;  %v2089_v54 = vpop.xlane.xlu0 %2088  ;;  %vm2148_vm2 = vcmp.eq.f32.partialorder %v2147_v63, 8.507059e+37  ;;  %v2150_v10 = vor.u32 1.1754944e-38, %v2149_v0 }
 0xaf0   : > { %v2094_v53 = vmul.f32 %v2827_v52, %v2083_v49  ;;  %2830 = vrcp.f32 %v2089_v54  ;;  %vm2099_vm5 = vweird.f32 %v2827_v52  ;;  %v2132_v11 = vand.u32 2147483647, %v2089_v54 }
 0xaf1   : > { %vm2100_vm12 = vmor %vm2098_vm11, %vm2099_vm5  ;;  %v2134_v12 = vand.u32 2147483648, %v2089_v54  ;;  %vm2128_vm8 = vweird.f32 %v2089_v54 }
 0xaf2   : > { %v2095_v55 = vsub.f32 1.0, %v2094_v53  ;;  %vm2133_vm10 = vcmp.eq.f32.partialorder %v2132_v11, 8.507059e+37 }
 0xaf3   : > { %v2829_v56 = vpop.eup %2828  ;;  %v2135_v22 = vor.u32 1.1754944e-38, %v2134_v12 }
 0xaf4   : > { %v2096_v59 = vmul.f32 %v2827_v52, %v2095_v55  ;;  %v2139_v60 = vmul.f32 %v2829_v56, %v2092_v50  ;;  %vm2144_vm14 = vweird.f32 %v2829_v56 }
 0xaf5   : > { %vm2145_vm1 = vmor %vm2143_vm15, %vm2144_vm14 }
 0xaf6   : > { %v2097_v46 = vadd.f32 %v2827_v52, %v2096_v59  ;;  %v2140_v61 = vsub.f32 1.0, %v2139_v60  ;;  %v2831_v48 = vpop.eup %2830 }
 0xaf7   : > { %v2124_v3 = vmul.f32 %v2831_v48, %v2089_v54  ;;  %v2086_v4 = vpop.xlane.xlu0 %2085  ;;  %vm2129_vm3 = vweird.f32 %v2831_v48 }
 0xaf8   : > { %v2101_v1 = vsel %vm2100_vm12, %v2827_v52, %v2097_v46  ;;  %v2141_v51 = vmul.f32 %v2829_v56, %v2140_v61  ;;  %2832 = vrcp.f32 %v2086_v4  ;;  %vm2130_vm9 = vmor %vm2128_vm8, %vm2129_vm3  ;;  %v2119_v31 = vand.u32 2147483648, %v2086_v4 }
 0xaf9   : > { %v2106_v5 = vsel %vm2103_vm13, %v2105_v62, %v2101_v1  ;;  %v2125_v9 = vsub.f32 1.0, %v2124_v3  ;;  %vm2113_vm11 = vweird.f32 %v2086_v4 }
 0xafa   : > { %v2107_v6 = vmul.f32 %v3399_v21, %v2106_v5  ;;  %v2142_v7 = vadd.f32 %v2829_v56, %v2141_v51  ;;  %v2120_v36 = vor.u32 1.1754944e-38, %v2119_v31 }
 0xafb   : > { %v2126_v15 = vmul.f32 %v2831_v48, %v2125_v9 }
 0xafc   : > { %v2146_v13 = vsel %vm2145_vm1, %v2829_v56, %v2142_v7  ;;  %v2153_v16 = vpack.c.bf16 %v2107_v6, %v2107_v6 }
 0xafd   : > { %v2151_v17 = vsel %vm2148_vm2, %v2150_v10, %v2146_v13  ;;  %v2127_v20 = vadd.f32 %v2831_v48, %v2126_v15 }
 0xafe   : > { %v2152_v19 = vmul.f32 %v3403_v18, %v2151_v17  ;;  %2675 = vmatmul.msk.bf16.vlgmr.msrb.gmra.mxu0 %vm992_vm6, %v2153_v16  ;;  %v2833_v21 = vpop.eup %2832  ;;  %v2117_v18 = vand.u32 2147483647, %v2086_v4 }
 0xaff   : > { %v2131_v23 = vsel %vm2130_vm9, %v2831_v48, %v2127_v20  ;;  %v2109_v24 = vmul.f32 %v2833_v21, %v2086_v4  ;;  %vm2114_vm5 = vweird.f32 %v2833_v21  ;;  %v2785_v4 = vld [vmem:[%s3562_s7 + $0x1] ss:$0 sm:$0xff] }
 0xb00   : > { %v2156_v25 = vpack.c.bf16 %v2152_v19, %v2152_v19  ;;  %v2136_v26 = vsel %vm2133_vm10, %v2135_v22, %v2131_v23  ;;  %vm2115_vm12 = vmor %vm2113_vm11, %vm2114_vm5  ;;  %vm2118_vm13 = vcmp.eq.f32.partialorder %v2117_v18, 8.507059e+37  ;;  %v2786_v18 = vld [vmem:[%s3563_s8 + $0x1] ss:$0 sm:$0xff] }
 0xb01   : > { %v2137_v28 = vmul.f32 %v3407_v27, %v2136_v26  ;;  %v2110_v29 = vsub.f32 1.0, %v2109_v24 }
 0xb02   : > { %2678 = vmatmul.msk.bf16.vlgmr.msrb.gmra.mxu3 %vm992_vm6, %v2156_v25 }
 0xb03   : > { %v2111_v32 = vmul.f32 %v2833_v21, %v2110_v29  ;;  %v2155_v45 = vpack.c.bf16 %v2137_v28, %v2137_v28 }
 0xb05   : > { %v2112_v35 = vadd.f32 %v2833_v21, %v2111_v32  ;;  %2677 = vmatmul.msk.bf16.vlgmr.msrb.gmra.mxu2 %vm992_vm6, %v2155_v45 }
 0xb07   : > { %v2116_v37 = vsel %vm2115_vm12, %v2833_v21, %v2112_v35  ;;  %v2746_v21 = vld [vmem:[%s3565_s10 + $0x18] sm:$0xff]  ;;  %v2787_v35 = vld [vmem:[%s3564_s9 + $0x1] ss:$0 sm:$0xff] }
 0xb08   : > { %v2121_v38 = vsel %vm2118_vm13, %v2120_v36, %v2116_v37  ;;  %2398 = vmatpush.bf16.msrb.mxu0 %v2746_v21 }
 0xb09   : > { %v2122_v39 = vmul.f32 %v3411_v33, %v2121_v38  ;;  %v2284_v33 = vsel %vm1183_vm7, %v2681_v42, 0 }
 0xb0a   : > { %2293 = vmatpush.bf16.msra.mxu2 %v2284_v33 }
 0xb0b   : > { %v2154_v27 = vpack.c.bf16 %v2122_v39, %v2122_v39 }
 0xb0d   : > { %2676 = vmatmul.msk.bf16.vlgmr.msrb.gmra.mxu1 %vm992_vm6, %v2154_v27  ;;  %v2788_v27 = vld [vmem:[%s3566_s11 + $0x1] ss:$0 sm:$0xff] }
 0xb7b   : > { %v2172_v2 = vpop.f32.mrf.mxu0 }
 0xb7c   : > { %v2233_v43 = vpack.c.bf16 %v2172_v2, %v2172_v2 }
 0xb7e   : > { %2683 = vmatmul.msk.bf16.vlgmr.msra.gmra.mxu0 %vm992_vm6, %v2233_v43 }
 0xb83   : > { %v2174_v49 = vpop.f32.mrf.mxu0 }
 0xb84   : > { %v2750_v49 = vld [vmem:[%s3567_s12 + $0x38] sm:$0xff] }
 0xb85   : > { %v2229_v50 = vpop.f32.mrf.mxu3  ;;  %2495 = vmatpush.bf16.msrb.mxu1 %v2750_v49 }
 0xb86   : > { %v2236_v52 = vpack.c.bf16 %v2229_v50, %v2229_v50 }
 0xb88   : > { %2686 = vmatmul.msk.bf16.vlgmr.msra.gmra.mxu3 %vm992_vm6, %v2236_v52  ;;  %v2210_v53 = vpop.f32.mrf.mxu2 }
 0xb89   : > { %v2235_v54 = vpack.c.bf16 %v2210_v53, %v2210_v53 }
 0xb8a   : > { %v2191_v55 = vpop.f32.mrf.mxu1 }
 0xb8b   : > { %v2234_v56 = vpack.c.bf16 %v2191_v55, %v2191_v55  ;;  %2685 = vmatmul.msk.bf16.vlgmr.msra.gmra.mxu2 %vm992_vm6, %v2235_v54  ;;  %v2749_v54 = vld [vmem:[%s3567_s12 + $0x30] sm:$0xff] }
 0xb8c   : > { %2496 = vmatpush.bf16.msrb.mxu1 %v2749_v54 }
 0xb8d   : > { %v2231_v57 = vpop.f32.mrf.mxu3  ;;  %2684 = vmatmul.msk.bf16.vlgmr.msra.gmra.mxu1 %vm992_vm6, %v2234_v56 }
 0xb90   : > { %v2212_v58 = vpop.f32.mrf.mxu2 }
 0xb91   : > { %v2748_v58 = vld [vmem:[%s3567_s12 + $0x28] sm:$0xff] }
 0xb92   : > { %v2193_v59 = vpop.f32.mrf.mxu1  ;;  %2497 = vmatpush.bf16.msrb.mxu1 %v2748_v58 }
 0xbfb   : > { %v2257_v60 = vpop.f32.mrf.mxu0 }
 0xbfc   : > { %v2318_v63 = vsel %vm536_vm0, %v2257_v60, 0.0 }
 0xc03   : > { %v2259_v46 = vpop.f32.mrf.mxu0 }
 0xc04   : > { %v2747_v46 = vld [vmem:[%s3567_s12 + $0x20] sm:$0xff] }
 0xc05   : > { %2498 = vmatpush.bf16.msrb.mxu1 %v2747_v46 }
 0xc0a   : > { %v2276_v61 = vpop.f32.mrf.mxu1 }
 0xc0b   : > { %v2314_v48 = vpop.f32.mrf.mxu3  ;;  %v2319_v62 = vsel %vm536_vm0, %v2276_v61, 0.0 }
 0xc0c   : > { %v2320_v0 = vadd.f32 %v2319_v62, %v2318_v63  ;;  %v2323_v5 = vsel %vm536_vm0, %v2314_v48, 0.0 }
 0xc0e   : > { %v2295_v1 = vpop.f32.mrf.mxu2 }
 0xc0f   : > { %v2321_v51 = vsel %vm536_vm0, %v2295_v1, 0.0 }
 0xc10   : > { %v2322_v3 = vadd.f32 %v2321_v51, %v2320_v0 }
 0xc12   : > { %v2324_v6 = vadd.f32 %v2323_v5, %v2322_v3  ;;  %v2278_v7 = vpop.f32.mrf.mxu1 }
 0xc13   : > { %v2316_v9 = vpop.f32.mrf.mxu3 }
 0xc14   : > { %v2330_v10 = vadd.f32 %v2785_v4, %v2324_v6 }
 0xc16   : > { %v2297_v11 = vpop.f32.mrf.mxu2  ;;  %v2331_v12 = vadd.f32 %v2330_v10, %v3272_v14  ;;  %v2745_v14 = vld [vmem:[%s3565_s10 + $0x10] sm:$0xff] }
 0xc17   : > { %2399 = vmatpush.bf16.msrb.mxu0 %v2745_v14 }
 0xc18   : > { %v2336_v13 = vsel %vm536_vm0, %v2331_v12, 0.0 }
 0xc19   : > { %2337 = vadd.xlane.f32.xlu1 %v2336_v13 }
 0xc8c   : > { %v2338_v15 = vpop.xlane.xlu1 %2337 }
 0xc8d   : > { %v2339_v16 = vmul.f32 %v2338_v15, %v2971_v8 }
 0xc8f   : > { %v2340_v17 = vsub.f32 %v2331_v12, %v2339_v16 }
 0xc91   : > { %v2341_v19 = vmul.f32 %v2340_v17, %v2340_v17 }
 0xc93   : > { %v2342_v20 = vsel %vm536_vm0, %v2341_v19, 0.0 }
 0xc94   : > { %2343 = vadd.xlane.f32.xlu2 %v2342_v20 }
 0xd07   : > { %v2344_v22 = vpop.xlane.xlu2 %2343 }
 0xd08   : > { %v2345_v23 = vmul.f32 %v2344_v22, %v2971_v8 }
 0xd0a   : > { %v2346_v24 = vadd.f32 1e-12, %v2345_v23  ;;  %v2789_v23 = vld [vmem:[%s3568_s13 + $0x1] ss:$0 sm:$0xff] }
 0xd0c   : > { %2834 = vrsqrt.f32 %v2346_v24  ;;  %vm2353_vm7 = vweird.f32 %v2346_v24 }
 0xd12   : > { %v2835_v25 = vpop.eup %2834 }
 0xd13   : > { %v2348_v26 = vmul.f32 %v2835_v25, %v2346_v24  ;;  %vm2354_vm6 = vweird.f32 %v2835_v25 }
 0xd14   : > { %vm2355_vm14 = vmor %vm2353_vm7, %vm2354_vm6 }
 0xd15   : > { %v2349_v28 = vmul.f32 %v2835_v25, %v2348_v26 }
 0xd17   : > { %v2350_v29 = vmul.f32 0.5, %v2349_v28 }
 0xd19   : > { %v2351_v31 = vsub.f32 1.5, %v2350_v29 }
 0xd1b   : > { %v2352_v32 = vmul.f32 %v2835_v25, %v2351_v31 }
 0xd1d   : > { %v2356_v45 = vsel %vm2355_vm14, %v2835_v25, %v2352_v32 }
 0xd1e   : > { %v2357_v36 = vmul.f32 %v2356_v45, %v2340_v17 }
 0xd20   : > { %v2361_v37 = vmul.f32 %v2786_v18, %v2357_v36 }
 0xd22   : > { %v3511_v38 = vadd.f32 %v2787_v35, %v2361_v37 }
 0xd24   : > { %v2366_v39 = vpack.c.bf16 %v3511_v38, %v3511_v38 }
 0xd26   : > { %2703 = vmatmul.msk.bf16.vlgmr.msrb.gmra.mxu0 %vm536_vm0, %v2366_v39 }
 0xda3   : > { %v2401_v40 = vpop.f32.mrf.mxu0 }
 0xda4   : > { %v2402_v41 = vadd.f32 %v2788_v27, %v2401_v40 }
 0xda6   : > { %v2406_v42 = vmul.f32 0.70710677, %v2402_v41  ;;  %v2405_v20 = vmul.f32 0.5, %v2402_v41 }
 0xda8   : > { %v2407_v44 = vmul.f32 %v2406_v42, %v2406_v42 }
 0xdaa   : > { %v2408_v33 = vmin.f32 %v2407_v44, 16.0 }
 0xdab   : > { %v2403_v34 = vpop.f32.mrf.mxu0 }
 0xdac   : > { %v2409_v47 = vmul.f32 2.1237322e-06, %v2408_v33  ;;  %v2420_v30 = vmul.f32 3.8918573e-05, %v2408_v33 }
 0xdae   : > { %v2410_v2 = vadd.f32 0.00028619796, %v2409_v47  ;;  %v2421_v43 = vadd.f32 0.001143296, %v2420_v30 }
 0xdb0   : > { %v2411_v50 = vmul.f32 %v2410_v2, %v2408_v33  ;;  %v2422_v52 = vmul.f32 %v2421_v43, %v2408_v33 }
 0xdb2   : > { %v2423_v53 = vadd.f32 0.014752088, %v2422_v52  ;;  %v2412_v55 = vadd.f32 0.0036580483, %v2411_v50 }
 0xdb4   : > { %v2424_v56 = vmul.f32 %v2423_v53, %v2408_v33  ;;  %v2413_v59 = vmul.f32 %v2412_v55, %v2408_v33 }
 0xdb6   : > { %v2425_v57 = vadd.f32 0.112945676, %v2424_v56  ;;  %v2414_v48 = vadd.f32 0.05243302, %v2413_v59 }
 0xdb8   : > { %v2426_v60 = vmul.f32 %v2425_v57, %v2408_v33  ;;  %v2415_v0 = vmul.f32 %v2414_v48, %v2408_v33 }
 0xdba   : > { %v2427_v61 = vadd.f32 0.4994258, %v2426_v60  ;;  %v2416_v1 = vadd.f32 0.18741608, %v2415_v0 }
 0xdbc   : > { %v2428_v62 = vmul.f32 %v2427_v61, %v2408_v33  ;;  %v2417_v3 = vmul.f32 %v2416_v1, %v2408_v33  ;;  %v2790_v33 = vld [vmem:[%s3569_s14 + $0x1] ss:$0 sm:$0xff] }
 0xdbe   : > { %v2429_v63 = vadd.f32 1.0, %v2428_v62  ;;  %v2418_v7 = vadd.f32 1.1283791, %v2417_v3 }
 0xdc0   : > { %2836 = vrcp.f32 %v2429_v63  ;;  %v2441_v6 = vand.u32 2147483648, %v2429_v63  ;;  %v2439_v10 = vand.u32 2147483647, %v2429_v63  ;;  %vm2435_vm1 = vweird.f32 %v2429_v63 }
 0xdc1   : > { %v2419_v13 = vmul.f32 %v2418_v7, %v2406_v42 }
 0xdc2   : > { %v2442_v12 = vor.u32 1.1754944e-38, %v2441_v6  ;;  %vm2440_vm3 = vcmp.eq.f32.partialorder %v2439_v10, 8.507059e+37 }
 0xdc6   : > { %v2837_v51 = vpop.eup %2836 }
 0xdc7   : > { %v2431_v4 = vmul.f32 %v2837_v51, %v2429_v63  ;;  %vm2436_vm15 = vweird.f32 %v2837_v51 }
 0xdc8   : > { %vm2437_vm2 = vmor %vm2435_vm1, %vm2436_vm15 }
 0xdc9   : > { %v2432_v5 = vsub.f32 1.0, %v2431_v4 }
 0xdcb   : > { %v2433_v9 = vmul.f32 %v2837_v51, %v2432_v5 }
 0xdcd   : > { %v2434_v11 = vadd.f32 %v2837_v51, %v2433_v9 }
 0xdcf   : > { %v2438_v15 = vsel %vm2437_vm2, %v2837_v51, %v2434_v11 }
 0xdd0   : > { %v2443_v16 = vsel %vm2440_vm3, %v2442_v12, %v2438_v15 }
 0xdd1   : > { %v2444_v17 = vmul.f32 %v2443_v16, %v2419_v13 }
 0xdd3   : > { %v2704_v19 = vclamps-f32 %v2444_v17, 1.0 }
 0xdd5   : > { %v2447_v21 = vadd.f32 1.0, %v2704_v19 }
 0xdd7   : > { %v2448_v14 = vmul.f32 %v2447_v21, %v2405_v20 }
 0xdd9   : > { %v2449_v22 = vpack.c.bf16 %v2448_v14, %v2448_v14 }
 0xddb   : > { %2730 = vmatmul.msk.bf16.vlgmr.msrb.gmra.mxu1 %vm1504_vm4, %v2449_v22 }
 0xe58   : > { %v2500_v24 = vpop.f32.mrf.mxu1 }
 0xe59   : > { %v2501_v25 = vadd.f32 %v2789_v23, %v2500_v24 }
 0xe5b   : > { %v2504_v26 = vadd.f32 %v2501_v25, %v3511_v38 }
 0xe5d   : > { %v2509_v28 = vsel %vm536_vm0, %v2504_v26, 0.0 }
 0xe5e   : > { %2510 = vadd.xlane.f32.xlu0 %v2509_v28 }
 0xe60   : > { %v2502_v29 = vpop.f32.mrf.mxu1 }
 0xed1   : > { %v2511_v31 = vpop.xlane.xlu0 %2510 }
 0xed2   : > { %v2512_v32 = vmul.f32 %v2511_v31, %v2971_v8 }
 0xed4   : > { %v2513_v18 = vsub.f32 %v2504_v26, %v2512_v32 }
 0xed6   : > { %v2514_v45 = vmul.f32 %v2513_v18, %v2513_v18 }
 0xed8   : > { %v2515_v35 = vsel %vm536_vm0, %v2514_v45, 0.0 }
 0xed9   : > { %2516 = vadd.xlane.f32.xlu1 %v2515_v35 }
 0xf4c   : > { %v2517_v36 = vpop.xlane.xlu1 %2516 }
 0xf4d   : > { %v2518_v37 = vmul.f32 %v2517_v36, %v2971_v8  ;;  %v2791_v8 = vld [vmem:[%s3570_s15 + $0x1] ss:$0 sm:$0xff] }
 0xf4f   : > { %v2519_v39 = vadd.f32 1e-12, %v2518_v37 }
 0xf51   : > { %2838 = vrsqrt.f32 %v2519_v39  ;;  %vm2526_vm8 = vweird.f32 %v2519_v39 }
 0xf57   : > { %v2839_v27 = vpop.eup %2838 }
 0xf58   : > { %v2521_v38 = vmul.f32 %v2839_v27, %v2519_v39  ;;  %vm2527_vm4 = vweird.f32 %v2839_v27 }
 0xf59   : > { %vm2528_vm9 = vmor %vm2526_vm8, %vm2527_vm4 }
 0xf5a   : > { %v2522_v40 = vmul.f32 %v2839_v27, %v2521_v38 }
 0xf5c   : > { %v2523_v41 = vmul.f32 0.5, %v2522_v40 }
 0xf5e   : > { %v2524_v42 = vsub.f32 1.5, %v2523_v41 }
 0xf60   : > { %v2525_v44 = vmul.f32 %v2839_v27, %v2524_v42 }
 0xf62   : > { %v2529_v34 = vsel %vm2528_vm9, %v2839_v27, %v2525_v44 }
 0xf63   : > { %v2530_v47 = vmul.f32 %v2529_v34, %v2513_v18 }
 0xf65   : > { %v2534_v30 = vmul.f32 %v2790_v33, %v2530_v47 }
 0xf67   : > { %v2538_v2 = vadd.f32 %v2791_v8, %v2534_v30 }
 0xf69   : > { %2539 = vst.msk [vmem:[%s530_s17] sm:$0xff] %vm536_vm0, %v2538_v2 }
 0xf6a PF: > { %s26_s21 = sadd.s32 1, %s2847_s21  }
 0xf6b   : > { %p23_p4 = scmp.ge.s32.totalorder %s26_s21, 4  }
 0xf6d   :  { %25 = sbr.rel (!%p23_p4) target bundleno = 2 (0x2), region = 129 }

</bundles_post_ra>
